<compile_context>
chip_gen: v7x
topology: tpu7x:2x2x1
jax: 0.10.0
libtpu: 0.0.40
codegen_flags: <defaults>
</compile_context>

<pallas_src>
import jax
import jax.numpy as jnp
import numpy as np
from jax.experimental import pallas as pl
from jax.experimental.pallas import tpu as pltpu

# ---- model / problem sizes (small, consistent with the module) --------------
B = 2              # batch
L = 600            # promoter length (multiple of 300 so pooling is exact)
C_IN = 4
C1 = 128
K1 = 6             # conv1 kernel, PyTorch 'same' pad = (2, 3)
PAD1_L, PAD1_R = 2, 3
P1 = 30            # pool1
C2 = 32
K2 = 9             # conv2 kernel, 'same' pad = (4, 4)
PAD2_L, PAD2_R = 4, 4
P2 = 10            # pool2
L1 = L // P1       # 20
L2 = L1 // P2      # 2
HL = 8             # halflife feature width
FC1_IN = C2 * L2 + HL   # 72 (fc1 in_features, set via set_fc1_infeatures)
FC1_OUT = 64
FC2_OUT = 2
KC1 = K1 * C_IN    # 24    conv1 im2col width
KC2 = K2 * C1      # 1152  conv2 im2col width (9 x 128)

# ---- kernel-internal layout constants ---------------------------------------
W = B * L1              # 40  rows per conv1 pool-phase (both batches)
CH = 2                  # conv1 pool-phases fused per matmul chunk
CW = CH * W             # 80  conv1 rows per chunk (16-sublane aligned, bf16)
NCHUNK = P1 // CH       # 15
B1R = PAD2_L + L1       # 24  batch-1 offset in the conv2 pad buffer / acc2
M2 = 2 * L1 + PAD2_L    # 44  conv2 batched-window rows (middle 4 discarded)
PAD2_ROWS = 56          # conv2 pad buffer rows (52 used, padded to 8-multiple)


def best_conv_kernel(x_ref, hl_ref,
                     w1_ref, b1_ref, w2_ref, b2_ref,
                     wfc1_ref, bfc1_ref, wfc2_ref, bfc2_ref,
                     wout_ref, bout_ref,
                     out_ref, pad2_ref):
    # ---- conv1 (4->128, k=6, 'same') with maxpool(30) fused into the MXU
    # drain.  x_ref rows are ordered (pool phase p, batch g, window w), so
    # every chunk / half-chunk slice is 16-sublane aligned (bf16).  The
    # (40,128) f32 running max stays register-resident; the 600 KB monolithic
    # conv1 intermediate is never materialized in VMEM.
    def chunk_pool(c):
        r = jnp.dot(x_ref[c * CW:(c + 1) * CW, :], w1_ref[...],
                    preferred_element_type=jnp.float32)      # (80, 128) f32
        return jnp.maximum(r[0:W, :], r[W:CW, :])            # (40, 128)

    pooled = chunk_pool(0)
    for c in range(1, NCHUNK):
        pooled = jnp.maximum(pooled, chunk_pool(c))
    # bias + ReLU commute with max -> applied once on the pooled rows.
    act1 = jnp.maximum(pooled + b1_ref[...], 0.0)            # (40, 128) f32

    # ---- conv2 'same' pad buffer shared by both batches:
    #   rows [0:4)=0 | [4:24)=batch0 | [24:28)=0 | [28:48)=batch1 | [48:56)=0
    # Only the halo rows are zeroed; the interiors are fully overwritten.
    pad2_ref[0:PAD2_L, :] = jnp.zeros((PAD2_L, C1), jnp.float32)
    pad2_ref[B1R:B1R + PAD2_L, :] = jnp.zeros((PAD2_L, C1), jnp.float32)
    pad2_ref[2 * B1R:PAD2_ROWS, :] = jnp.zeros((PAD2_ROWS - 2 * B1R, C1),
                                               jnp.float32)
    pad2_ref[PAD2_L:PAD2_L + L1, :] = act1[0:L1, :]
    pad2_ref[B1R + PAD2_L:B1R + PAD2_L + L1, :] = act1[L1:2 * L1, :]

    # ---- conv2 (128->32, k=9, 'same'): 9 accumulating (44,128)@(128,32)
    # matmuls over the shared buffer — no lane-concat copies.  Result rows
    # [0:20) are batch0, [24:44) are batch1; rows [20:24) only ever overlap
    # the shared zero halo and are discarded.
    acc2 = jnp.dot(pad2_ref[0:M2, :].astype(jnp.bfloat16), w2_ref[0:C1, :],
                   preferred_element_type=jnp.float32)
    for k in range(1, K2):
        acc2 = acc2 + jnp.dot(pad2_ref[k:k + M2, :].astype(jnp.bfloat16),
                              w2_ref[k * C1:(k + 1) * C1, :],
                              preferred_element_type=jnp.float32)
    act2 = jnp.maximum(acc2 + b2_ref[...], 0.0)              # (44, 32) f32

    # ---- maxpool(10); PyTorch's channel-major flatten is folded into the
    # (t*C2 + c) row ordering of wfc1_ref, so fc1 is 3 batched dots over
    # sublane-aligned weight slices (rows 0:32, 32:64, 64:72).
    p_t0 = jnp.concatenate(
        [jnp.max(act2[0:P2, :], axis=0, keepdims=True),
         jnp.max(act2[B1R:B1R + P2, :], axis=0, keepdims=True)], axis=0)
    p_t1 = jnp.concatenate(
        [jnp.max(act2[P2:L1, :], axis=0, keepdims=True),
         jnp.max(act2[B1R + P2:B1R + L1, :], axis=0, keepdims=True)], axis=0)
    h1 = (bfc1_ref[...]
          + jnp.dot(p_t0, wfc1_ref[0:C2, :],
                    preferred_element_type=jnp.float32)
          + jnp.dot(p_t1, wfc1_ref[C2:2 * C2, :],
                    preferred_element_type=jnp.float32)
          + jnp.dot(hl_ref[...], wfc1_ref[2 * C2:FC1_IN, :],
                    preferred_element_type=jnp.float32))
    h1 = jnp.maximum(h1, 0.0)                                # (2, 64)
    # dropout1 / dropout2 are identity in eval mode.

    # ---- fc2 + out head on the VPU/XLU (M=2, N<=2 MXU matmuls would waste a
    # weight push + result drain each).
    h2a = jnp.maximum(jnp.sum(h1 * wfc2_ref[0:1, :], axis=-1, keepdims=True)
                      + bfc2_ref[0:1, 0:1], 0.0)             # (2, 1)
    h2b = jnp.maximum(jnp.sum(h1 * wfc2_ref[1:2, :], axis=-1, keepdims=True)
                      + bfc2_ref[0:1, 1:2], 0.0)             # (2, 1)
    out_ref[...] = (h2a * wout_ref[0:1, 0:1] + h2b * wout_ref[0:1, 1:2]
                    + bout_ref[...])                          # (2, 1)


@jax.jit
def _best_conv_forward(promoter_x, halflife_x, params):
    w1, b1, w2, b2, wfc1, bfc1, wfc2, bfc2, wout, bout = params

    # ---- glue (plain JAX): 'same' pad, im2col, weight re-layout, bf16 cast.
    xpad = jnp.pad(promoter_x, ((0, 0), (PAD1_L, PAD1_R), (0, 0)))  # (B,605,4)
    xim = jnp.stack([xpad[:, k:k + L, :] for k in range(K1)], axis=2)
    # rows ordered (pool phase p, batch g, window w): every pool-phase / batch
    # slice inside the kernel starts on a 16-sublane (bf16) boundary.
    xim = xim.reshape(B, L1, P1, KC1)
    xim = jnp.transpose(xim, (2, 0, 1, 3)).reshape(P1 * W, KC1)
    xim = xim.astype(jnp.bfloat16)

    w1r = jnp.transpose(w1, (2, 1, 0)).reshape(KC1, C1).astype(jnp.bfloat16)
    w2r = jnp.transpose(w2, (2, 1, 0)).reshape(KC2, C2).astype(jnp.bfloat16)
    # fc1 weight: conv rows re-ordered from PyTorch's (c*L2 + t) flatten order
    # to the kernel's (t*C2 + c) feature order; halflife rows appended last.
    wfc1c = jnp.transpose(wfc1[:, :C2 * L2].T.reshape(C2, L2, FC1_OUT),
                          (1, 0, 2)).reshape(C2 * L2, FC1_OUT)
    wfc1_full = jnp.concatenate([wfc1c, wfc1[:, C2 * L2:].T], axis=0)  # (72,64)

    flops = 2 * (P1 * W * KC1 * C1 + M2 * KC2 * C2
                 + B * FC1_IN * FC1_OUT + B * FC1_OUT * FC2_OUT + B * FC2_OUT)
    bytes_accessed = (P1 * W * KC1 * 2 + KC1 * C1 * 2 + KC2 * C2 * 2
                      + FC1_IN * FC1_OUT * 4 + FC2_OUT * FC1_OUT * 4
                      + (C1 + C2 + FC1_OUT + 2 * FC2_OUT + 1) * 4
                      + B * (HL + 1) * 4)

    in_specs = [
        pl.BlockSpec((P1 * W, KC1), lambda n: (0, 0)),       # xim (1200, 24)
        pl.BlockSpec((B, HL), lambda n: (0, 0)),             # halflife
        pl.BlockSpec((KC1, C1), lambda n: (0, 0)),           # w1r
        pl.BlockSpec((1, C1), lambda n: (0, 0)),             # b1
        pl.BlockSpec((KC2, C2), lambda n: (0, 0)),           # w2r
        pl.BlockSpec((1, C2), lambda n: (0, 0)),             # b2
        pl.BlockSpec((FC1_IN, FC1_OUT), lambda n: (0, 0)),   # wfc1
        pl.BlockSpec((1, FC1_OUT), lambda n: (0, 0)),        # bfc1
        pl.BlockSpec((FC2_OUT, FC1_OUT), lambda n: (0, 0)),  # wfc2
        pl.BlockSpec((1, FC2_OUT), lambda n: (0, 0)),        # bfc2
        pl.BlockSpec((1, FC2_OUT), lambda n: (0, 0)),        # wout
        pl.BlockSpec((1, 1), lambda n: (0, 0)),              # bout
    ]

    out = pl.pallas_call(
        best_conv_kernel,
        out_shape=jax.ShapeDtypeStruct((B, 1), jnp.float32),
        grid_spec=pltpu.PrefetchScalarGridSpec(
            num_scalar_prefetch=0,
            grid=(1,),
            in_specs=in_specs,
            out_specs=pl.BlockSpec((B, 1), lambda n: (0, 0)),
            scratch_shapes=[pltpu.VMEM((PAD2_ROWS, C1), jnp.float32)],
        ),
        compiler_params=pltpu.CompilerParams(
            dimension_semantics=("arbitrary",)),
        cost_estimate=pl.CostEstimate(flops=flops, transcendentals=0,
                                      bytes_accessed=bytes_accessed),
    )(xim, halflife_x,
      w1r, b1.reshape(1, C1),
      w2r, b2.reshape(1, C2),
      wfc1_full, bfc1.reshape(1, FC1_OUT),
      wfc2, bfc2.reshape(1, FC2_OUT),
      wout, bout.reshape(1, 1))
    return out


def best_conv_model(promoter_x, halflife_x, params):
    """promoter_x: (B, L, 4) f32, halflife_x: (B, HL) f32 -> (B, 1) f32."""
    return _best_conv_forward(promoter_x, halflife_x, params)


def reference(promoter_x, halflife_x, params):
    """Pure-JAX mirror of the PyTorch forward (dropout = identity, f32)."""
    w1, b1, w2, b2, wfc1, bfc1, wfc2, bfc2, wout, bout = params
    x = jnp.pad(promoter_x, ((0, 0), (PAD1_L, PAD1_R), (0, 0)))
    c1 = jnp.zeros((B, L, C1), jnp.float32)
    for k in range(K1):
        c1 = c1 + jnp.einsum('btc,oc->bto', x[:, k:k + L, :], w1[:, :, k])
    c1 = jax.nn.relu(c1 + b1[None, None, :])
    p1 = jnp.max(c1.reshape(B, L1, P1, C1), axis=2)
    xp2 = jnp.pad(p1, ((0, 0), (PAD2_L, PAD2_R), (0, 0)))
    c2 = jnp.zeros((B, L1, C2), jnp.float32)
    for k in range(K2):
        c2 = c2 + jnp.einsum('btc,oc->bto', xp2[:, k:k + L1, :], w2[:, :, k])
    c2 = jax.nn.relu(c2 + b2[None, None, :])
    p2 = jnp.max(c2.reshape(B, L2, P2, C2), axis=2)          # (B, L2, C2)
    flat = jnp.transpose(p2, (0, 2, 1)).reshape(B, C2 * L2)  # channel-major
    feat = jnp.concatenate([flat, halflife_x], axis=1)
    h1 = jax.nn.relu(feat @ wfc1.T + bfc1)
    h2 = jax.nn.relu(h1 @ wfc2.T + bfc2)
    return h2 @ wout.T + bout


def init_params(key):
    ks = jax.random.split(key, 9)
    s = 0.1
    w1 = s * jax.random.normal(ks[0], (C1, C_IN, K1), jnp.float32)
    b1 = s * jax.random.normal(ks[1], (C1,), jnp.float32)
    w2 = s * jax.random.normal(ks[2], (C2, C1, K2), jnp.float32)
    b2 = s * jax.random.normal(ks[3], (C2,), jnp.float32)
    wfc1 = s * jax.random.normal(ks[4], (FC1_OUT, FC1_IN), jnp.float32)
    bfc1 = jnp.zeros((FC1_OUT,), jnp.float32)
    wfc2 = s * jax.random.normal(ks[5], (FC2_OUT, FC1_OUT), jnp.float32)
    bfc2 = s * jax.random.normal(ks[6], (FC2_OUT,), jnp.float32)
    wout = s * jax.random.normal(ks[7], (1, FC2_OUT), jnp.float32)
    bout = s * jax.random.normal(ks[8], (1,), jnp.float32)
    return (w1, b1, w2, b2, wfc1, bfc1, wfc2, bfc2, wout, bout)


if __name__ == "__main__":
    key = jax.random.PRNGKey(0)
    kp, kx, kh = jax.random.split(key, 3)
    params = init_params(kp)
    promoter_x = jax.random.normal(kx, (B, L, C_IN), jnp.float32)
    halflife_x = jax.random.normal(kh, (B, HL), jnp.float32)

    out = best_conv_model(promoter_x, halflife_x, params)
    out = jax.block_until_ready(out)

    ref = reference(promoter_x, halflife_x, params)
    # Conv matmuls use bf16 operands (f32 accumulation), so compare at
    # bf16-level tolerance against the f32 reference.
    np.testing.assert_allclose(np.asarray(out), np.asarray(ref),
                               rtol=2e-2, atol=2e-2)
    print("KERNEL_OK")
</pallas_src>

<mosaic_0001>
module attributes {stable_mosaic.version = 11 : i64} {
  func.func @best_conv_kernel(%arg0: i32, %arg1: memref<1200x24xbf16, #tpu.memory_space<vmem>>, %arg2: memref<2x8xf32, #tpu.memory_space<vmem>>, %arg3: memref<24x128xbf16, #tpu.memory_space<vmem>>, %arg4: memref<1x128xf32, #tpu.memory_space<vmem>>, %arg5: memref<1152x32xbf16, #tpu.memory_space<vmem>>, %arg6: memref<1x32xf32, #tpu.memory_space<vmem>>, %arg7: memref<72x64xf32, #tpu.memory_space<vmem>>, %arg8: memref<1x64xf32, #tpu.memory_space<vmem>>, %arg9: memref<2x64xf32, #tpu.memory_space<vmem>>, %arg10: memref<1x2xf32, #tpu.memory_space<vmem>>, %arg11: memref<1x2xf32, #tpu.memory_space<vmem>>, %arg12: memref<1x1xf32, #tpu.memory_space<vmem>>, %arg13: memref<2x1xf32, #tpu.memory_space<vmem>>, %arg14: memref<56x128xf32, #tpu.memory_space<vmem>>) attributes {dimension_semantics = [#tpu.dimension_semantics<arbitrary>], iteration_bounds = array<i64: 1>, scalar_prefetch = 0 : i64, scratch_operands = 1 : i64, tpu.core_type = #tpu.core_type<tc>, window_params = [{pipeline_mode = #tpu.pipeline_mode<synchronous>, transform_indices = @transform_0, window_bounds = array<i64: 1200, 24>}, {pipeline_mode = #tpu.pipeline_mode<synchronous>, transform_indices = @transform_1, window_bounds = array<i64: 2, 8>}, {pipeline_mode = #tpu.pipeline_mode<synchronous>, transform_indices = @transform_2, window_bounds = array<i64: 24, 128>}, {pipeline_mode = #tpu.pipeline_mode<synchronous>, transform_indices = @transform_3, window_bounds = array<i64: 1, 128>}, {pipeline_mode = #tpu.pipeline_mode<synchronous>, transform_indices = @transform_4, window_bounds = array<i64: 1152, 32>}, {pipeline_mode = #tpu.pipeline_mode<synchronous>, transform_indices = @transform_5, window_bounds = array<i64: 1, 32>}, {pipeline_mode = #tpu.pipeline_mode<synchronous>, transform_indices = @transform_6, window_bounds = array<i64: 72, 64>}, {pipeline_mode = #tpu.pipeline_mode<synchronous>, transform_indices = @transform_7, window_bounds = array<i64: 1, 64>}, {pipeline_mode = #tpu.pipeline_mode<synchronous>, transform_indices = @transform_8, window_bounds = array<i64: 2, 64>}, {pipeline_mode = #tpu.pipeline_mode<synchronous>, transform_indices = @transform_9, window_bounds = array<i64: 1, 2>}, {pipeline_mode = #tpu.pipeline_mode<synchronous>, transform_indices = @transform_10, window_bounds = array<i64: 1, 2>}, {pipeline_mode = #tpu.pipeline_mode<synchronous>, transform_indices = @transform_11, window_bounds = array<i64: 1, 1>}, {pipeline_mode = #tpu.pipeline_mode<synchronous>, transform_indices = @transform_12, window_bounds = array<i64: 2, 1>}]} {
    %c0 = arith.constant 0 : index
    %c0_0 = arith.constant 0 : index
    %0 = vector.load %arg1[%c0, %c0_0] : memref<1200x24xbf16, #tpu.memory_space<vmem>>, vector<80x24xbf16>
    %c0_1 = arith.constant 0 : index
    %c0_2 = arith.constant 0 : index
    %1 = vector.load %arg3[%c0_1, %c0_2] : memref<24x128xbf16, #tpu.memory_space<vmem>>, vector<24x128xbf16>
    %cst = arith.constant dense<0.000000e+00> : vector<80x128xf32>
    %2 = tpu.matmul %0, %1, %cst {dimension_numbers = #tpu.dot_dimension_numbers<[1], [0], [0], [1], [0, 0, 1, 1], [], []>} : vector<80x24xbf16>, vector<24x128xbf16>, vector<80x128xf32> -> vector<80x128xf32>
    %3 = vector.extract_strided_slice %2 {offsets = [0, 0], sizes = [40, 128], strides = [1, 1]} : vector<80x128xf32> to vector<40x128xf32>
    %4 = vector.extract_strided_slice %2 {offsets = [40, 0], sizes = [40, 128], strides = [1, 1]} : vector<80x128xf32> to vector<40x128xf32>
    %5 = arith.maximumf %3, %4 : vector<40x128xf32>
    %c80 = arith.constant 80 : index
    %c0_3 = arith.constant 0 : index
    %6 = vector.load %arg1[%c80, %c0_3] : memref<1200x24xbf16, #tpu.memory_space<vmem>>, vector<80x24xbf16>
    %c0_4 = arith.constant 0 : index
    %c0_5 = arith.constant 0 : index
    %7 = vector.load %arg3[%c0_4, %c0_5] : memref<24x128xbf16, #tpu.memory_space<vmem>>, vector<24x128xbf16>
    %cst_6 = arith.constant dense<0.000000e+00> : vector<80x128xf32>
    %8 = tpu.matmul %6, %7, %cst_6 {dimension_numbers = #tpu.dot_dimension_numbers<[1], [0], [0], [1], [0, 0, 1, 1], [], []>} : vector<80x24xbf16>, vector<24x128xbf16>, vector<80x128xf32> -> vector<80x128xf32>
    %9 = vector.extract_strided_slice %8 {offsets = [0, 0], sizes = [40, 128], strides = [1, 1]} : vector<80x128xf32> to vector<40x128xf32>
    %10 = vector.extract_strided_slice %8 {offsets = [40, 0], sizes = [40, 128], strides = [1, 1]} : vector<80x128xf32> to vector<40x128xf32>
    %11 = arith.maximumf %9, %10 : vector<40x128xf32>
    %12 = arith.maximumf %5, %11 : vector<40x128xf32>
    %c160 = arith.constant 160 : index
    %c0_7 = arith.constant 0 : index
    %13 = vector.load %arg1[%c160, %c0_7] : memref<1200x24xbf16, #tpu.memory_space<vmem>>, vector<80x24xbf16>
    %c0_8 = arith.constant 0 : index
    %c0_9 = arith.constant 0 : index
    %14 = vector.load %arg3[%c0_8, %c0_9] : memref<24x128xbf16, #tpu.memory_space<vmem>>, vector<24x128xbf16>
    %cst_10 = arith.constant dense<0.000000e+00> : vector<80x128xf32>
    %15 = tpu.matmul %13, %14, %cst_10 {dimension_numbers = #tpu.dot_dimension_numbers<[1], [0], [0], [1], [0, 0, 1, 1], [], []>} : vector<80x24xbf16>, vector<24x128xbf16>, vector<80x128xf32> -> vector<80x128xf32>
    %16 = vector.extract_strided_slice %15 {offsets = [0, 0], sizes = [40, 128], strides = [1, 1]} : vector<80x128xf32> to vector<40x128xf32>
    %17 = vector.extract_strided_slice %15 {offsets = [40, 0], sizes = [40, 128], strides = [1, 1]} : vector<80x128xf32> to vector<40x128xf32>
    %18 = arith.maximumf %16, %17 : vector<40x128xf32>
    %19 = arith.maximumf %12, %18 : vector<40x128xf32>
    %c240 = arith.constant 240 : index
    %c0_11 = arith.constant 0 : index
    %20 = vector.load %arg1[%c240, %c0_11] : memref<1200x24xbf16, #tpu.memory_space<vmem>>, vector<80x24xbf16>
    %c0_12 = arith.constant 0 : index
    %c0_13 = arith.constant 0 : index
    %21 = vector.load %arg3[%c0_12, %c0_13] : memref<24x128xbf16, #tpu.memory_space<vmem>>, vector<24x128xbf16>
    %cst_14 = arith.constant dense<0.000000e+00> : vector<80x128xf32>
    %22 = tpu.matmul %20, %21, %cst_14 {dimension_numbers = #tpu.dot_dimension_numbers<[1], [0], [0], [1], [0, 0, 1, 1], [], []>} : vector<80x24xbf16>, vector<24x128xbf16>, vector<80x128xf32> -> vector<80x128xf32>
    %23 = vector.extract_strided_slice %22 {offsets = [0, 0], sizes = [40, 128], strides = [1, 1]} : vector<80x128xf32> to vector<40x128xf32>
    %24 = vector.extract_strided_slice %22 {offsets = [40, 0], sizes = [40, 128], strides = [1, 1]} : vector<80x128xf32> to vector<40x128xf32>
    %25 = arith.maximumf %23, %24 : vector<40x128xf32>
    %26 = arith.maximumf %19, %25 : vector<40x128xf32>
    %c320 = arith.constant 320 : index
    %c0_15 = arith.constant 0 : index
    %27 = vector.load %arg1[%c320, %c0_15] : memref<1200x24xbf16, #tpu.memory_space<vmem>>, vector<80x24xbf16>
    %c0_16 = arith.constant 0 : index
    %c0_17 = arith.constant 0 : index
    %28 = vector.load %arg3[%c0_16, %c0_17] : memref<24x128xbf16, #tpu.memory_space<vmem>>, vector<24x128xbf16>
    %cst_18 = arith.constant dense<0.000000e+00> : vector<80x128xf32>
    %29 = tpu.matmul %27, %28, %cst_18 {dimension_numbers = #tpu.dot_dimension_numbers<[1], [0], [0], [1], [0, 0, 1, 1], [], []>} : vector<80x24xbf16>, vector<24x128xbf16>, vector<80x128xf32> -> vector<80x128xf32>
    %30 = vector.extract_strided_slice %29 {offsets = [0, 0], sizes = [40, 128], strides = [1, 1]} : vector<80x128xf32> to vector<40x128xf32>
    %31 = vector.extract_strided_slice %29 {offsets = [40, 0], sizes = [40, 128], strides = [1, 1]} : vector<80x128xf32> to vector<40x128xf32>
    %32 = arith.maximumf %30, %31 : vector<40x128xf32>
    %33 = arith.maximumf %26, %32 : vector<40x128xf32>
    %c400 = arith.constant 400 : index
    %c0_19 = arith.constant 0 : index
    %34 = vector.load %arg1[%c400, %c0_19] : memref<1200x24xbf16, #tpu.memory_space<vmem>>, vector<80x24xbf16>
    %c0_20 = arith.constant 0 : index
    %c0_21 = arith.constant 0 : index
    %35 = vector.load %arg3[%c0_20, %c0_21] : memref<24x128xbf16, #tpu.memory_space<vmem>>, vector<24x128xbf16>
    %cst_22 = arith.constant dense<0.000000e+00> : vector<80x128xf32>
    %36 = tpu.matmul %34, %35, %cst_22 {dimension_numbers = #tpu.dot_dimension_numbers<[1], [0], [0], [1], [0, 0, 1, 1], [], []>} : vector<80x24xbf16>, vector<24x128xbf16>, vector<80x128xf32> -> vector<80x128xf32>
    %37 = vector.extract_strided_slice %36 {offsets = [0, 0], sizes = [40, 128], strides = [1, 1]} : vector<80x128xf32> to vector<40x128xf32>
    %38 = vector.extract_strided_slice %36 {offsets = [40, 0], sizes = [40, 128], strides = [1, 1]} : vector<80x128xf32> to vector<40x128xf32>
    %39 = arith.maximumf %37, %38 : vector<40x128xf32>
    %40 = arith.maximumf %33, %39 : vector<40x128xf32>
    %c480 = arith.constant 480 : index
    %c0_23 = arith.constant 0 : index
    %41 = vector.load %arg1[%c480, %c0_23] : memref<1200x24xbf16, #tpu.memory_space<vmem>>, vector<80x24xbf16>
    %c0_24 = arith.constant 0 : index
    %c0_25 = arith.constant 0 : index
    %42 = vector.load %arg3[%c0_24, %c0_25] : memref<24x128xbf16, #tpu.memory_space<vmem>>, vector<24x128xbf16>
    %cst_26 = arith.constant dense<0.000000e+00> : vector<80x128xf32>
    %43 = tpu.matmul %41, %42, %cst_26 {dimension_numbers = #tpu.dot_dimension_numbers<[1], [0], [0], [1], [0, 0, 1, 1], [], []>} : vector<80x24xbf16>, vector<24x128xbf16>, vector<80x128xf32> -> vector<80x128xf32>
    %44 = vector.extract_strided_slice %43 {offsets = [0, 0], sizes = [40, 128], strides = [1, 1]} : vector<80x128xf32> to vector<40x128xf32>
    %45 = vector.extract_strided_slice %43 {offsets = [40, 0], sizes = [40, 128], strides = [1, 1]} : vector<80x128xf32> to vector<40x128xf32>
    %46 = arith.maximumf %44, %45 : vector<40x128xf32>
    %47 = arith.maximumf %40, %46 : vector<40x128xf32>
    %c560 = arith.constant 560 : index
    %c0_27 = arith.constant 0 : index
    %48 = vector.load %arg1[%c560, %c0_27] : memref<1200x24xbf16, #tpu.memory_space<vmem>>, vector<80x24xbf16>
    %c0_28 = arith.constant 0 : index
    %c0_29 = arith.constant 0 : index
    %49 = vector.load %arg3[%c0_28, %c0_29] : memref<24x128xbf16, #tpu.memory_space<vmem>>, vector<24x128xbf16>
    %cst_30 = arith.constant dense<0.000000e+00> : vector<80x128xf32>
    %50 = tpu.matmul %48, %49, %cst_30 {dimension_numbers = #tpu.dot_dimension_numbers<[1], [0], [0], [1], [0, 0, 1, 1], [], []>} : vector<80x24xbf16>, vector<24x128xbf16>, vector<80x128xf32> -> vector<80x128xf32>
    %51 = vector.extract_strided_slice %50 {offsets = [0, 0], sizes = [40, 128], strides = [1, 1]} : vector<80x128xf32> to vector<40x128xf32>
    %52 = vector.extract_strided_slice %50 {offsets = [40, 0], sizes = [40, 128], strides = [1, 1]} : vector<80x128xf32> to vector<40x128xf32>
    %53 = arith.maximumf %51, %52 : vector<40x128xf32>
    %54 = arith.maximumf %47, %53 : vector<40x128xf32>
    %c640 = arith.constant 640 : index
    %c0_31 = arith.constant 0 : index
    %55 = vector.load %arg1[%c640, %c0_31] : memref<1200x24xbf16, #tpu.memory_space<vmem>>, vector<80x24xbf16>
    %c0_32 = arith.constant 0 : index
    %c0_33 = arith.constant 0 : index
    %56 = vector.load %arg3[%c0_32, %c0_33] : memref<24x128xbf16, #tpu.memory_space<vmem>>, vector<24x128xbf16>
    %cst_34 = arith.constant dense<0.000000e+00> : vector<80x128xf32>
    %57 = tpu.matmul %55, %56, %cst_34 {dimension_numbers = #tpu.dot_dimension_numbers<[1], [0], [0], [1], [0, 0, 1, 1], [], []>} : vector<80x24xbf16>, vector<24x128xbf16>, vector<80x128xf32> -> vector<80x128xf32>
    %58 = vector.extract_strided_slice %57 {offsets = [0, 0], sizes = [40, 128], strides = [1, 1]} : vector<80x128xf32> to vector<40x128xf32>
    %59 = vector.extract_strided_slice %57 {offsets = [40, 0], sizes = [40, 128], strides = [1, 1]} : vector<80x128xf32> to vector<40x128xf32>
    %60 = arith.maximumf %58, %59 : vector<40x128xf32>
    %61 = arith.maximumf %54, %60 : vector<40x128xf32>
    %c720 = arith.constant 720 : index
    %c0_35 = arith.constant 0 : index
    %62 = vector.load %arg1[%c720, %c0_35] : memref<1200x24xbf16, #tpu.memory_space<vmem>>, vector<80x24xbf16>
    %c0_36 = arith.constant 0 : index
    %c0_37 = arith.constant 0 : index
    %63 = vector.load %arg3[%c0_36, %c0_37] : memref<24x128xbf16, #tpu.memory_space<vmem>>, vector<24x128xbf16>
    %cst_38 = arith.constant dense<0.000000e+00> : vector<80x128xf32>
    %64 = tpu.matmul %62, %63, %cst_38 {dimension_numbers = #tpu.dot_dimension_numbers<[1], [0], [0], [1], [0, 0, 1, 1], [], []>} : vector<80x24xbf16>, vector<24x128xbf16>, vector<80x128xf32> -> vector<80x128xf32>
    %65 = vector.extract_strided_slice %64 {offsets = [0, 0], sizes = [40, 128], strides = [1, 1]} : vector<80x128xf32> to vector<40x128xf32>
    %66 = vector.extract_strided_slice %64 {offsets = [40, 0], sizes = [40, 128], strides = [1, 1]} : vector<80x128xf32> to vector<40x128xf32>
    %67 = arith.maximumf %65, %66 : vector<40x128xf32>
    %68 = arith.maximumf %61, %67 : vector<40x128xf32>
    %c800 = arith.constant 800 : index
    %c0_39 = arith.constant 0 : index
    %69 = vector.load %arg1[%c800, %c0_39] : memref<1200x24xbf16, #tpu.memory_space<vmem>>, vector<80x24xbf16>
    %c0_40 = arith.constant 0 : index
    %c0_41 = arith.constant 0 : index
    %70 = vector.load %arg3[%c0_40, %c0_41] : memref<24x128xbf16, #tpu.memory_space<vmem>>, vector<24x128xbf16>
    %cst_42 = arith.constant dense<0.000000e+00> : vector<80x128xf32>
    %71 = tpu.matmul %69, %70, %cst_42 {dimension_numbers = #tpu.dot_dimension_numbers<[1], [0], [0], [1], [0, 0, 1, 1], [], []>} : vector<80x24xbf16>, vector<24x128xbf16>, vector<80x128xf32> -> vector<80x128xf32>
    %72 = vector.extract_strided_slice %71 {offsets = [0, 0], sizes = [40, 128], strides = [1, 1]} : vector<80x128xf32> to vector<40x128xf32>
    %73 = vector.extract_strided_slice %71 {offsets = [40, 0], sizes = [40, 128], strides = [1, 1]} : vector<80x128xf32> to vector<40x128xf32>
    %74 = arith.maximumf %72, %73 : vector<40x128xf32>
    %75 = arith.maximumf %68, %74 : vector<40x128xf32>
    %c880 = arith.constant 880 : index
    %c0_43 = arith.constant 0 : index
    %76 = vector.load %arg1[%c880, %c0_43] : memref<1200x24xbf16, #tpu.memory_space<vmem>>, vector<80x24xbf16>
    %c0_44 = arith.constant 0 : index
    %c0_45 = arith.constant 0 : index
    %77 = vector.load %arg3[%c0_44, %c0_45] : memref<24x128xbf16, #tpu.memory_space<vmem>>, vector<24x128xbf16>
    %cst_46 = arith.constant dense<0.000000e+00> : vector<80x128xf32>
    %78 = tpu.matmul %76, %77, %cst_46 {dimension_numbers = #tpu.dot_dimension_numbers<[1], [0], [0], [1], [0, 0, 1, 1], [], []>} : vector<80x24xbf16>, vector<24x128xbf16>, vector<80x128xf32> -> vector<80x128xf32>
    %79 = vector.extract_strided_slice %78 {offsets = [0, 0], sizes = [40, 128], strides = [1, 1]} : vector<80x128xf32> to vector<40x128xf32>
    %80 = vector.extract_strided_slice %78 {offsets = [40, 0], sizes = [40, 128], strides = [1, 1]} : vector<80x128xf32> to vector<40x128xf32>
    %81 = arith.maximumf %79, %80 : vector<40x128xf32>
    %82 = arith.maximumf %75, %81 : vector<40x128xf32>
    %c960 = arith.constant 960 : index
    %c0_47 = arith.constant 0 : index
    %83 = vector.load %arg1[%c960, %c0_47] : memref<1200x24xbf16, #tpu.memory_space<vmem>>, vector<80x24xbf16>
    %c0_48 = arith.constant 0 : index
    %c0_49 = arith.constant 0 : index
    %84 = vector.load %arg3[%c0_48, %c0_49] : memref<24x128xbf16, #tpu.memory_space<vmem>>, vector<24x128xbf16>
    %cst_50 = arith.constant dense<0.000000e+00> : vector<80x128xf32>
    %85 = tpu.matmul %83, %84, %cst_50 {dimension_numbers = #tpu.dot_dimension_numbers<[1], [0], [0], [1], [0, 0, 1, 1], [], []>} : vector<80x24xbf16>, vector<24x128xbf16>, vector<80x128xf32> -> vector<80x128xf32>
    %86 = vector.extract_strided_slice %85 {offsets = [0, 0], sizes = [40, 128], strides = [1, 1]} : vector<80x128xf32> to vector<40x128xf32>
    %87 = vector.extract_strided_slice %85 {offsets = [40, 0], sizes = [40, 128], strides = [1, 1]} : vector<80x128xf32> to vector<40x128xf32>
    %88 = arith.maximumf %86, %87 : vector<40x128xf32>
    %89 = arith.maximumf %82, %88 : vector<40x128xf32>
    %c1040 = arith.constant 1040 : index
    %c0_51 = arith.constant 0 : index
    %90 = vector.load %arg1[%c1040, %c0_51] : memref<1200x24xbf16, #tpu.memory_space<vmem>>, vector<80x24xbf16>
    %c0_52 = arith.constant 0 : index
    %c0_53 = arith.constant 0 : index
    %91 = vector.load %arg3[%c0_52, %c0_53] : memref<24x128xbf16, #tpu.memory_space<vmem>>, vector<24x128xbf16>
    %cst_54 = arith.constant dense<0.000000e+00> : vector<80x128xf32>
    %92 = tpu.matmul %90, %91, %cst_54 {dimension_numbers = #tpu.dot_dimension_numbers<[1], [0], [0], [1], [0, 0, 1, 1], [], []>} : vector<80x24xbf16>, vector<24x128xbf16>, vector<80x128xf32> -> vector<80x128xf32>
    %93 = vector.extract_strided_slice %92 {offsets = [0, 0], sizes = [40, 128], strides = [1, 1]} : vector<80x128xf32> to vector<40x128xf32>
    %94 = vector.extract_strided_slice %92 {offsets = [40, 0], sizes = [40, 128], strides = [1, 1]} : vector<80x128xf32> to vector<40x128xf32>
    %95 = arith.maximumf %93, %94 : vector<40x128xf32>
    %96 = arith.maximumf %89, %95 : vector<40x128xf32>
    %c1120 = arith.constant 1120 : index
    %c0_55 = arith.constant 0 : index
    %97 = vector.load %arg1[%c1120, %c0_55] : memref<1200x24xbf16, #tpu.memory_space<vmem>>, vector<80x24xbf16>
    %c0_56 = arith.constant 0 : index
    %c0_57 = arith.constant 0 : index
    %98 = vector.load %arg3[%c0_56, %c0_57] : memref<24x128xbf16, #tpu.memory_space<vmem>>, vector<24x128xbf16>
    %cst_58 = arith.constant dense<0.000000e+00> : vector<80x128xf32>
    %99 = tpu.matmul %97, %98, %cst_58 {dimension_numbers = #tpu.dot_dimension_numbers<[1], [0], [0], [1], [0, 0, 1, 1], [], []>} : vector<80x24xbf16>, vector<24x128xbf16>, vector<80x128xf32> -> vector<80x128xf32>
    %100 = vector.extract_strided_slice %99 {offsets = [0, 0], sizes = [40, 128], strides = [1, 1]} : vector<80x128xf32> to vector<40x128xf32>
    %101 = vector.extract_strided_slice %99 {offsets = [40, 0], sizes = [40, 128], strides = [1, 1]} : vector<80x128xf32> to vector<40x128xf32>
    %102 = arith.maximumf %100, %101 : vector<40x128xf32>
    %103 = arith.maximumf %96, %102 : vector<40x128xf32>
    %c0_59 = arith.constant 0 : index
    %c0_60 = arith.constant 0 : index
    %104 = vector.load %arg4[%c0_59, %c0_60] : memref<1x128xf32, #tpu.memory_space<vmem>>, vector<1x128xf32>
    %105 = vector.broadcast %104 : vector<1x128xf32> to vector<40x128xf32>
    %106 = arith.addf %103, %105 : vector<40x128xf32>
    %cst_61 = arith.constant 0.000000e+00 : f32
    %107 = vector.broadcast %cst_61 : f32 to vector<40x128xf32>
    %108 = arith.maximumf %106, %107 : vector<40x128xf32>
    %cst_62 = arith.constant 0.000000e+00 : f32
    %109 = vector.broadcast %cst_62 : f32 to vector<4x128xf32>
    %c0_63 = arith.constant 0 : index
    %c0_64 = arith.constant 0 : index
    %110 = vector.load %arg14[%c0_63, %c0_64] : memref<56x128xf32, #tpu.memory_space<vmem>>, vector<4x128xf32>
    tpu.vector_store %arg14[%c0_63, %c0_64], %109 {strides = array<i32>} : memref<56x128xf32, #tpu.memory_space<vmem>>, vector<4x128xf32>,
    %cst_65 = arith.constant 0.000000e+00 : f32
    %111 = vector.broadcast %cst_65 : f32 to vector<4x128xf32>
    %c24 = arith.constant 24 : index
    %c0_66 = arith.constant 0 : index
    %112 = vector.load %arg14[%c24, %c0_66] : memref<56x128xf32, #tpu.memory_space<vmem>>, vector<4x128xf32>
    tpu.vector_store %arg14[%c24, %c0_66], %111 {strides = array<i32>} : memref<56x128xf32, #tpu.memory_space<vmem>>, vector<4x128xf32>,
    %cst_67 = arith.constant 0.000000e+00 : f32
    %113 = vector.broadcast %cst_67 : f32 to vector<8x128xf32>
    %c48 = arith.constant 48 : index
    %c0_68 = arith.constant 0 : index
    %114 = vector.load %arg14[%c48, %c0_68] : memref<56x128xf32, #tpu.memory_space<vmem>>, vector<8x128xf32>
    tpu.vector_store %arg14[%c48, %c0_68], %113 {strides = array<i32>} : memref<56x128xf32, #tpu.memory_space<vmem>>, vector<8x128xf32>,
    %115 = vector.extract_strided_slice %108 {offsets = [0, 0], sizes = [20, 128], strides = [1, 1]} : vector<40x128xf32> to vector<20x128xf32>
    %c4 = arith.constant 4 : index
    %c0_69 = arith.constant 0 : index
    %116 = vector.load %arg14[%c4, %c0_69] : memref<56x128xf32, #tpu.memory_space<vmem>>, vector<20x128xf32>
    tpu.vector_store %arg14[%c4, %c0_69], %115 {strides = array<i32>} : memref<56x128xf32, #tpu.memory_space<vmem>>, vector<20x128xf32>,
    %117 = vector.extract_strided_slice %108 {offsets = [20, 0], sizes = [20, 128], strides = [1, 1]} : vector<40x128xf32> to vector<20x128xf32>
    %c28 = arith.constant 28 : index
    %c0_70 = arith.constant 0 : index
    %118 = vector.load %arg14[%c28, %c0_70] : memref<56x128xf32, #tpu.memory_space<vmem>>, vector<20x128xf32>
    tpu.vector_store %arg14[%c28, %c0_70], %117 {strides = array<i32>} : memref<56x128xf32, #tpu.memory_space<vmem>>, vector<20x128xf32>,
    %c0_71 = arith.constant 0 : index
    %c0_72 = arith.constant 0 : index
    %119 = vector.load %arg14[%c0_71, %c0_72] : memref<56x128xf32, #tpu.memory_space<vmem>>, vector<44x128xf32>
    %120 = arith.truncf %119 : vector<44x128xf32> to vector<44x128xbf16>
    %c0_73 = arith.constant 0 : index
    %c0_74 = arith.constant 0 : index
    %121 = vector.load %arg5[%c0_73, %c0_74] : memref<1152x32xbf16, #tpu.memory_space<vmem>>, vector<128x32xbf16>
    %cst_75 = arith.constant dense<0.000000e+00> : vector<44x32xf32>
    %122 = tpu.matmul %120, %121, %cst_75 {dimension_numbers = #tpu.dot_dimension_numbers<[1], [0], [0], [1], [0, 0, 1, 1], [], []>} : vector<44x128xbf16>, vector<128x32xbf16>, vector<44x32xf32> -> vector<44x32xf32>
    %c1 = arith.constant 1 : index
    %c0_76 = arith.constant 0 : index
    %123 = vector.load %arg14[%c1, %c0_76] : memref<56x128xf32, #tpu.memory_space<vmem>>, vector<44x128xf32>
    %124 = arith.truncf %123 : vector<44x128xf32> to vector<44x128xbf16>
    %c128 = arith.constant 128 : index
    %c0_77 = arith.constant 0 : index
    %125 = vector.load %arg5[%c128, %c0_77] : memref<1152x32xbf16, #tpu.memory_space<vmem>>, vector<128x32xbf16>
    %cst_78 = arith.constant dense<0.000000e+00> : vector<44x32xf32>
    %126 = tpu.matmul %124, %125, %cst_78 {dimension_numbers = #tpu.dot_dimension_numbers<[1], [0], [0], [1], [0, 0, 1, 1], [], []>} : vector<44x128xbf16>, vector<128x32xbf16>, vector<44x32xf32> -> vector<44x32xf32>
    %127 = arith.addf %122, %126 : vector<44x32xf32>
    %c2 = arith.constant 2 : index
    %c0_79 = arith.constant 0 : index
    %128 = vector.load %arg14[%c2, %c0_79] : memref<56x128xf32, #tpu.memory_space<vmem>>, vector<44x128xf32>
    %129 = arith.truncf %128 : vector<44x128xf32> to vector<44x128xbf16>
    %c256 = arith.constant 256 : index
    %c0_80 = arith.constant 0 : index
    %130 = vector.load %arg5[%c256, %c0_80] : memref<1152x32xbf16, #tpu.memory_space<vmem>>, vector<128x32xbf16>
    %cst_81 = arith.constant dense<0.000000e+00> : vector<44x32xf32>
    %131 = tpu.matmul %129, %130, %cst_81 {dimension_numbers = #tpu.dot_dimension_numbers<[1], [0], [0], [1], [0, 0, 1, 1], [], []>} : vector<44x128xbf16>, vector<128x32xbf16>, vector<44x32xf32> -> vector<44x32xf32>
    %132 = arith.addf %127, %131 : vector<44x32xf32>
    %c3 = arith.constant 3 : index
    %c0_82 = arith.constant 0 : index
    %133 = vector.load %arg14[%c3, %c0_82] : memref<56x128xf32, #tpu.memory_space<vmem>>, vector<44x128xf32>
    %134 = arith.truncf %133 : vector<44x128xf32> to vector<44x128xbf16>
    %c384 = arith.constant 384 : index
    %c0_83 = arith.constant 0 : index
    %135 = vector.load %arg5[%c384, %c0_83] : memref<1152x32xbf16, #tpu.memory_space<vmem>>, vector<128x32xbf16>
    %cst_84 = arith.constant dense<0.000000e+00> : vector<44x32xf32>
    %136 = tpu.matmul %134, %135, %cst_84 {dimension_numbers = #tpu.dot_dimension_numbers<[1], [0], [0], [1], [0, 0, 1, 1], [], []>} : vector<44x128xbf16>, vector<128x32xbf16>, vector<44x32xf32> -> vector<44x32xf32>
    %137 = arith.addf %132, %136 : vector<44x32xf32>
    %c4_85 = arith.constant 4 : index
    %c0_86 = arith.constant 0 : index
    %138 = vector.load %arg14[%c4_85, %c0_86] : memref<56x128xf32, #tpu.memory_space<vmem>>, vector<44x128xf32>
    %139 = arith.truncf %138 : vector<44x128xf32> to vector<44x128xbf16>
    %c512 = arith.constant 512 : index
    %c0_87 = arith.constant 0 : index
    %140 = vector.load %arg5[%c512, %c0_87] : memref<1152x32xbf16, #tpu.memory_space<vmem>>, vector<128x32xbf16>
    %cst_88 = arith.constant dense<0.000000e+00> : vector<44x32xf32>
    %141 = tpu.matmul %139, %140, %cst_88 {dimension_numbers = #tpu.dot_dimension_numbers<[1], [0], [0], [1], [0, 0, 1, 1], [], []>} : vector<44x128xbf16>, vector<128x32xbf16>, vector<44x32xf32> -> vector<44x32xf32>
    %142 = arith.addf %137, %141 : vector<44x32xf32>
    %c5 = arith.constant 5 : index
    %c0_89 = arith.constant 0 : index
    %143 = vector.load %arg14[%c5, %c0_89] : memref<56x128xf32, #tpu.memory_space<vmem>>, vector<44x128xf32>
    %144 = arith.truncf %143 : vector<44x128xf32> to vector<44x128xbf16>
    %c640_90 = arith.constant 640 : index
    %c0_91 = arith.constant 0 : index
    %145 = vector.load %arg5[%c640_90, %c0_91] : memref<1152x32xbf16, #tpu.memory_space<vmem>>, vector<128x32xbf16>
    %cst_92 = arith.constant dense<0.000000e+00> : vector<44x32xf32>
    %146 = tpu.matmul %144, %145, %cst_92 {dimension_numbers = #tpu.dot_dimension_numbers<[1], [0], [0], [1], [0, 0, 1, 1], [], []>} : vector<44x128xbf16>, vector<128x32xbf16>, vector<44x32xf32> -> vector<44x32xf32>
    %147 = arith.addf %142, %146 : vector<44x32xf32>
    %c6 = arith.constant 6 : index
    %c0_93 = arith.constant 0 : index
    %148 = vector.load %arg14[%c6, %c0_93] : memref<56x128xf32, #tpu.memory_space<vmem>>, vector<44x128xf32>
    %149 = arith.truncf %148 : vector<44x128xf32> to vector<44x128xbf16>
    %c768 = arith.constant 768 : index
    %c0_94 = arith.constant 0 : index
    %150 = vector.load %arg5[%c768, %c0_94] : memref<1152x32xbf16, #tpu.memory_space<vmem>>, vector<128x32xbf16>
    %cst_95 = arith.constant dense<0.000000e+00> : vector<44x32xf32>
    %151 = tpu.matmul %149, %150, %cst_95 {dimension_numbers = #tpu.dot_dimension_numbers<[1], [0], [0], [1], [0, 0, 1, 1], [], []>} : vector<44x128xbf16>, vector<128x32xbf16>, vector<44x32xf32> -> vector<44x32xf32>
    %152 = arith.addf %147, %151 : vector<44x32xf32>
    %c7 = arith.constant 7 : index
    %c0_96 = arith.constant 0 : index
    %153 = vector.load %arg14[%c7, %c0_96] : memref<56x128xf32, #tpu.memory_space<vmem>>, vector<44x128xf32>
    %154 = arith.truncf %153 : vector<44x128xf32> to vector<44x128xbf16>
    %c896 = arith.constant 896 : index
    %c0_97 = arith.constant 0 : index
    %155 = vector.load %arg5[%c896, %c0_97] : memref<1152x32xbf16, #tpu.memory_space<vmem>>, vector<128x32xbf16>
    %cst_98 = arith.constant dense<0.000000e+00> : vector<44x32xf32>
    %156 = tpu.matmul %154, %155, %cst_98 {dimension_numbers = #tpu.dot_dimension_numbers<[1], [0], [0], [1], [0, 0, 1, 1], [], []>} : vector<44x128xbf16>, vector<128x32xbf16>, vector<44x32xf32> -> vector<44x32xf32>
    %157 = arith.addf %152, %156 : vector<44x32xf32>
    %c8 = arith.constant 8 : index
    %c0_99 = arith.constant 0 : index
    %158 = vector.load %arg14[%c8, %c0_99] : memref<56x128xf32, #tpu.memory_space<vmem>>, vector<44x128xf32>
    %159 = arith.truncf %158 : vector<44x128xf32> to vector<44x128xbf16>
    %c1024 = arith.constant 1024 : index
    %c0_100 = arith.constant 0 : index
    %160 = vector.load %arg5[%c1024, %c0_100] : memref<1152x32xbf16, #tpu.memory_space<vmem>>, vector<128x32xbf16>
    %cst_101 = arith.constant dense<0.000000e+00> : vector<44x32xf32>
    %161 = tpu.matmul %159, %160, %cst_101 {dimension_numbers = #tpu.dot_dimension_numbers<[1], [0], [0], [1], [0, 0, 1, 1], [], []>} : vector<44x128xbf16>, vector<128x32xbf16>, vector<44x32xf32> -> vector<44x32xf32>
    %162 = arith.addf %157, %161 : vector<44x32xf32>
    %c0_102 = arith.constant 0 : index
    %c0_103 = arith.constant 0 : index
    %163 = vector.load %arg6[%c0_102, %c0_103] : memref<1x32xf32, #tpu.memory_space<vmem>>, vector<1x32xf32>
    %164 = vector.broadcast %163 : vector<1x32xf32> to vector<44x32xf32>
    %165 = arith.addf %162, %164 : vector<44x32xf32>
    %cst_104 = arith.constant 0.000000e+00 : f32
    %166 = vector.broadcast %cst_104 : f32 to vector<44x32xf32>
    %167 = arith.maximumf %165, %166 : vector<44x32xf32>
    %168 = vector.extract_strided_slice %167 {offsets = [0, 0], sizes = [10, 32], strides = [1, 1]} : vector<44x32xf32> to vector<10x32xf32>
    %cst_105 = arith.constant dense<0xFF800000> : vector<32xf32>
    %169 = vector.multi_reduction <maximumf>, %168, %cst_105 [0] : vector<10x32xf32> to vector<32xf32>
    %170 = vector.shape_cast %169 : vector<32xf32> to vector<1x32xf32>
    %171 = vector.extract_strided_slice %167 {offsets = [24, 0], sizes = [10, 32], strides = [1, 1]} : vector<44x32xf32> to vector<10x32xf32>
    %cst_106 = arith.constant dense<0xFF800000> : vector<32xf32>
    %172 = vector.multi_reduction <maximumf>, %171, %cst_106 [0] : vector<10x32xf32> to vector<32xf32>
    %173 = vector.shape_cast %172 : vector<32xf32> to vector<1x32xf32>
    %174 = tpu.concatenate %170, %173 in 0 : vector<1x32xf32>, vector<1x32xf32> -> vector<2x32xf32>
    %175 = vector.extract_strided_slice %167 {offsets = [10, 0], sizes = [10, 32], strides = [1, 1]} : vector<44x32xf32> to vector<10x32xf32>
    %cst_107 = arith.constant dense<0xFF800000> : vector<32xf32>
    %176 = vector.multi_reduction <maximumf>, %175, %cst_107 [0] : vector<10x32xf32> to vector<32xf32>
    %177 = vector.shape_cast %176 : vector<32xf32> to vector<1x32xf32>
    %178 = vector.extract_strided_slice %167 {offsets = [34, 0], sizes = [10, 32], strides = [1, 1]} : vector<44x32xf32> to vector<10x32xf32>
    %cst_108 = arith.constant dense<0xFF800000> : vector<32xf32>
    %179 = vector.multi_reduction <maximumf>, %178, %cst_108 [0] : vector<10x32xf32> to vector<32xf32>
    %180 = vector.shape_cast %179 : vector<32xf32> to vector<1x32xf32>
    %181 = tpu.concatenate %177, %180 in 0 : vector<1x32xf32>, vector<1x32xf32> -> vector<2x32xf32>
    %c0_109 = arith.constant 0 : index
    %c0_110 = arith.constant 0 : index
    %182 = vector.load %arg8[%c0_109, %c0_110] : memref<1x64xf32, #tpu.memory_space<vmem>>, vector<1x64xf32>
    %c0_111 = arith.constant 0 : index
    %c0_112 = arith.constant 0 : index
    %183 = vector.load %arg7[%c0_111, %c0_112] : memref<72x64xf32, #tpu.memory_space<vmem>>, vector<32x64xf32>
    %cst_113 = arith.constant dense<0.000000e+00> : vector<2x64xf32>
    %184 = tpu.matmul %174, %183, %cst_113 {dimension_numbers = #tpu.dot_dimension_numbers<[1], [0], [0], [1], [0, 0, 1, 1], [], []>} : vector<2x32xf32>, vector<32x64xf32>, vector<2x64xf32> -> vector<2x64xf32>
    %185 = vector.broadcast %182 : vector<1x64xf32> to vector<2x64xf32>
    %186 = arith.addf %185, %184 : vector<2x64xf32>
    %c32 = arith.constant 32 : index
    %c0_114 = arith.constant 0 : index
    %187 = vector.load %arg7[%c32, %c0_114] : memref<72x64xf32, #tpu.memory_space<vmem>>, vector<32x64xf32>
    %cst_115 = arith.constant dense<0.000000e+00> : vector<2x64xf32>
    %188 = tpu.matmul %181, %187, %cst_115 {dimension_numbers = #tpu.dot_dimension_numbers<[1], [0], [0], [1], [0, 0, 1, 1], [], []>} : vector<2x32xf32>, vector<32x64xf32>, vector<2x64xf32> -> vector<2x64xf32>
    %189 = arith.addf %186, %188 : vector<2x64xf32>
    %c0_116 = arith.constant 0 : index
    %c0_117 = arith.constant 0 : index
    %190 = vector.load %arg2[%c0_116, %c0_117] : memref<2x8xf32, #tpu.memory_space<vmem>>, vector<2x8xf32>
    %c64 = arith.constant 64 : index
    %c0_118 = arith.constant 0 : index
    %191 = vector.load %arg7[%c64, %c0_118] : memref<72x64xf32, #tpu.memory_space<vmem>>, vector<8x64xf32>
    %cst_119 = arith.constant dense<0.000000e+00> : vector<2x64xf32>
    %192 = tpu.matmul %190, %191, %cst_119 {dimension_numbers = #tpu.dot_dimension_numbers<[1], [0], [0], [1], [0, 0, 1, 1], [], []>} : vector<2x8xf32>, vector<8x64xf32>, vector<2x64xf32> -> vector<2x64xf32>
    %193 = arith.addf %189, %192 : vector<2x64xf32>
    %cst_120 = arith.constant 0.000000e+00 : f32
    %194 = vector.broadcast %cst_120 : f32 to vector<2x64xf32>
    %195 = arith.maximumf %193, %194 : vector<2x64xf32>
    %c0_121 = arith.constant 0 : index
    %c0_122 = arith.constant 0 : index
    %196 = vector.load %arg9[%c0_121, %c0_122] : memref<2x64xf32, #tpu.memory_space<vmem>>, vector<1x64xf32>
    %197 = vector.broadcast %196 : vector<1x64xf32> to vector<2x64xf32>
    %198 = arith.mulf %195, %197 : vector<2x64xf32>
    %cst_123 = arith.constant dense<0.000000e+00> : vector<2xf32>
    %199 = vector.multi_reduction <add>, %198, %cst_123 [1] : vector<2x64xf32> to vector<2xf32>
    %200 = vector.shape_cast %199 : vector<2xf32> to vector<2x1xf32>
    %c0_124 = arith.constant 0 : index
    %c0_125 = arith.constant 0 : index
    %201 = vector.load %arg10[%c0_124, %c0_125] : memref<1x2xf32, #tpu.memory_space<vmem>>, vector<1x1xf32>
    %202 = vector.broadcast %201 : vector<1x1xf32> to vector<2x1xf32>
    %203 = arith.addf %200, %202 : vector<2x1xf32>
    %cst_126 = arith.constant 0.000000e+00 : f32
    %204 = vector.broadcast %cst_126 : f32 to vector<2x1xf32>
    %205 = arith.maximumf %203, %204 : vector<2x1xf32>
    %c1_127 = arith.constant 1 : index
    %c0_128 = arith.constant 0 : index
    %206 = vector.load %arg9[%c1_127, %c0_128] : memref<2x64xf32, #tpu.memory_space<vmem>>, vector<1x64xf32>
    %207 = vector.broadcast %206 : vector<1x64xf32> to vector<2x64xf32>
    %208 = arith.mulf %195, %207 : vector<2x64xf32>
    %cst_129 = arith.constant dense<0.000000e+00> : vector<2xf32>
    %209 = vector.multi_reduction <add>, %208, %cst_129 [1] : vector<2x64xf32> to vector<2xf32>
    %210 = vector.shape_cast %209 : vector<2xf32> to vector<2x1xf32>
    %c0_130 = arith.constant 0 : index
    %c1_131 = arith.constant 1 : index
    %211 = vector.load %arg10[%c0_130, %c1_131] : memref<1x2xf32, #tpu.memory_space<vmem>>, vector<1x1xf32>
    %212 = vector.broadcast %211 : vector<1x1xf32> to vector<2x1xf32>
    %213 = arith.addf %210, %212 : vector<2x1xf32>
    %cst_132 = arith.constant 0.000000e+00 : f32
    %214 = vector.broadcast %cst_132 : f32 to vector<2x1xf32>
    %215 = arith.maximumf %213, %214 : vector<2x1xf32>
    %c0_133 = arith.constant 0 : index
    %c0_134 = arith.constant 0 : index
    %216 = vector.load %arg11[%c0_133, %c0_134] : memref<1x2xf32, #tpu.memory_space<vmem>>, vector<1x1xf32>
    %217 = vector.broadcast %216 : vector<1x1xf32> to vector<2x1xf32>
    %218 = arith.mulf %205, %217 : vector<2x1xf32>
    %c0_135 = arith.constant 0 : index
    %c1_136 = arith.constant 1 : index
    %219 = vector.load %arg11[%c0_135, %c1_136] : memref<1x2xf32, #tpu.memory_space<vmem>>, vector<1x1xf32>
    %220 = vector.broadcast %219 : vector<1x1xf32> to vector<2x1xf32>
    %221 = arith.mulf %215, %220 : vector<2x1xf32>
    %222 = arith.addf %218, %221 : vector<2x1xf32>
    %c0_137 = arith.constant 0 : index
    %c0_138 = arith.constant 0 : index
    %223 = vector.load %arg12[%c0_137, %c0_138] : memref<1x1xf32, #tpu.memory_space<vmem>>, vector<1x1xf32>
    %224 = vector.broadcast %223 : vector<1x1xf32> to vector<2x1xf32>
    %225 = arith.addf %222, %224 : vector<2x1xf32>
    %c0_139 = arith.constant 0 : index
    %c0_140 = arith.constant 0 : index
    %226 = vector.load %arg13[%c0_139, %c0_140] : memref<2x1xf32, #tpu.memory_space<vmem>>, vector<2x1xf32>
    tpu.vector_store %arg13[%c0_139, %c0_140], %225 {strides = array<i32>} : memref<2x1xf32, #tpu.memory_space<vmem>>, vector<2x1xf32>,
    return
  }
  func.func @transform_0(%arg0: i32) -> (i32, i32) {
    %c0_i32 = arith.constant 0 : i32
    %c0_i32_0 = arith.constant 0 : i32
    %c0_i32_1 = arith.constant 0 : i32
    return %c0_i32, %c0_i32_0 : i32, i32
  }
  func.func @transform_1(%arg0: i32) -> (i32, i32) {
    %c0_i32 = arith.constant 0 : i32
    %c0_i32_0 = arith.constant 0 : i32
    %c0_i32_1 = arith.constant 0 : i32
    return %c0_i32, %c0_i32_0 : i32, i32
  }
  func.func @transform_2(%arg0: i32) -> (i32, i32) {
    %c0_i32 = arith.constant 0 : i32
    %c0_i32_0 = arith.constant 0 : i32
    %c0_i32_1 = arith.constant 0 : i32
    return %c0_i32, %c0_i32_0 : i32, i32
  }
  func.func @transform_3(%arg0: i32) -> (i32, i32) {
    %c0_i32 = arith.constant 0 : i32
    %c0_i32_0 = arith.constant 0 : i32
    %c0_i32_1 = arith.constant 0 : i32
    return %c0_i32, %c0_i32_0 : i32, i32
  }
  func.func @transform_4(%arg0: i32) -> (i32, i32) {
    %c0_i32 = arith.constant 0 : i32
    %c0_i32_0 = arith.constant 0 : i32
    %c0_i32_1 = arith.constant 0 : i32
    return %c0_i32, %c0_i32_0 : i32, i32
  }
  func.func @transform_5(%arg0: i32) -> (i32, i32) {
    %c0_i32 = arith.constant 0 : i32
    %c0_i32_0 = arith.constant 0 : i32
    %c0_i32_1 = arith.constant 0 : i32
    return %c0_i32, %c0_i32_0 : i32, i32
  }
  func.func @transform_6(%arg0: i32) -> (i32, i32) {
    %c0_i32 = arith.constant 0 : i32
    %c0_i32_0 = arith.constant 0 : i32
    %c0_i32_1 = arith.constant 0 : i32
    return %c0_i32, %c0_i32_0 : i32, i32
  }
  func.func @transform_7(%arg0: i32) -> (i32, i32) {
    %c0_i32 = arith.constant 0 : i32
    %c0_i32_0 = arith.constant 0 : i32
    %c0_i32_1 = arith.constant 0 : i32
    return %c0_i32, %c0_i32_0 : i32, i32
  }
  func.func @transform_8(%arg0: i32) -> (i32, i32) {
    %c0_i32 = arith.constant 0 : i32
    %c0_i32_0 = arith.constant 0 : i32
    %c0_i32_1 = arith.constant 0 : i32
    return %c0_i32, %c0_i32_0 : i32, i32
  }
  func.func @transform_9(%arg0: i32) -> (i32, i32) {
    %c0_i32 = arith.constant 0 : i32
    %c0_i32_0 = arith.constant 0 : i32
    %c0_i32_1 = arith.constant 0 : i32
    return %c0_i32, %c0_i32_0 : i32, i32
  }
  func.func @transform_10(%arg0: i32) -> (i32, i32) {
    %c0_i32 = arith.constant 0 : i32
    %c0_i32_0 = arith.constant 0 : i32
    %c0_i32_1 = arith.constant 0 : i32
    return %c0_i32, %c0_i32_0 : i32, i32
  }
  func.func @transform_11(%arg0: i32) -> (i32, i32) {
    %c0_i32 = arith.constant 0 : i32
    %c0_i32_0 = arith.constant 0 : i32
    %c0_i32_1 = arith.constant 0 : i32
    return %c0_i32, %c0_i32_0 : i32, i32
  }
  func.func @transform_12(%arg0: i32) -> (i32, i32) {
    %c0_i32 = arith.constant 0 : i32
    %c0_i32_0 = arith.constant 0 : i32
    %c0_i32_1 = arith.constant 0 : i32
    return %c0_i32, %c0_i32_0 : i32, i32
  }
}

</mosaic_0001>

<bundles_post_ra>
// kernel: _best_conv_forward.1
= control target key start
LH: loop header
LB: loop body
LE: loop exit
PB: predicated region body
PF: predicated region fallthrough
CT: control target
= control target key end

     0   :  { %v4912_v0 = vmov 0.0   ;;  %vm107_vm0 = vcmask 1043456   ;;  %vm4913_vm1 = vmmov 0   ;;  %vm91_vm2 = vcmask 195584   ;;  %s6034_s2 = inlined_call_operand.vmem [shape: bf16[24,128], index: 2, kind: input, shape index: {}]   ;;  %s6035_s0 = inlined_call_operand.vmem [shape: bf16[1200,24], index: 0, kind: input, shape index: {}]   ;;  %s6036_s4 = inlined_call_operand.vmem [shape: bf16[1152,32], index: 4, kind: input, shape index: {}]   ;;  %s6037_s3 = inlined_call_operand.vmem [shape: f32[1,128], index: 3, kind: input, shape index: {}]   ;;  %s6038_s6 = inlined_call_operand.vmem [shape: f32[72,64], index: 6, kind: input, shape index: {}]   ;;  %s6039_s5 = inlined_call_operand.vmem [shape: f32[1,32], index: 5, kind: input, shape index: {}]   ;;  %s6040_s1 = inlined_call_operand.vmem [shape: f32[2,8], index: 1, kind: input, shape index: {}]   ;;  %s6041_s7 = inlined_call_operand.vmem [shape: f32[1,64], index: 7, kind: input, shape index: {}]   ;;  %s6042_s8 = inlined_call_operand.vmem [shape: f32[2,64], index: 8, kind: input, shape index: {}]   ;;  %s6043_s11 = inlined_call_operand.<no memory space> [shape: f32[1,1], index: 11, kind: input, shape index: {}]   ;;  %s6044_s9 = inlined_call_operand.vmem [shape: f32[1,2], index: 9, kind: input, shape index: {}]   ;;  %s6045_s10 = inlined_call_operand.vmem [shape: f32[1,2], index: 10, kind: input, shape index: {}]   ;;  %s6046_s12 = inlined_call_operand.vmem [shape: f32[2,1], index: 12, kind: output, shape index: {}]  }
   0x1   :  { %4101 = vmatprep.subr.bf16.mxu0 %v4912_v0  ;;  %2068 = vst [vmem:[#allocation2] sm:$0xf] %v4912_v0  ;;  %2069 = vst [vmem:[#allocation2 + $0x18] sm:$0xf] %v4912_v0  ;;  %4125 = vmatprep.subr.bf16.mxu1 %v4912_v0  ;;  %v4989_v1 = vld [vmem:[%s6034_s2] sm:$0xff]   ;;  %v4763_v5 = vld [vmem:[%s6035_s0 + $0x28] sm:$0xff]  }
   0x2   :  { %2070 = vst [vmem:[#allocation2 + $0x30] sm:$0xff] %v4912_v0  ;;  %v4761_v2 = vld [vmem:[%s6034_s2 + $0x8] ss:$0 sps:$4 sm:$0xff]   ;;  %4105 = vmatprep.mubr.msk.bf16.mxu0 %vm4913_vm1, %v4912_v0  ;;  %4129 = vmatprep.mubr.msk.bf16.mxu1 %vm4913_vm1, %v4912_v0  ;;  %v4762_v4 = vld [vmem:[%s6035_s0] sm:$0xff]   ;;  %v4765_v7 = vld [vmem:[%s6035_s0 + $0x30] sm:$0xff]   ;;  %vm3308_vm3 = vcmask 261120  }
   0x3   :  { %4102 = vmatpush3.bf16.msra.mxu0 %v4989_v1  ;;  %4126 = vmatpush3.bf16.msra.mxu1 %v4989_v1  ;;  %v5002_v3 = vsel %vm107_vm0, %v4761_v2, 0  ;;  %v4764_v6 = vld [vmem:[%s6035_s0 + $0x8] sm:$0xff]   ;;  %v4766_v8 = vld [vmem:[%s6035_s0 + $0x10] sm:$0xff]   ;;  %v4767_v9 = vld [vmem:[%s6035_s0 + $0x38] sm:$0xff]   ;;  %vm3310_vm4 = vcmask 254976   ;;  %vm3330_vm5 = vcmask 261122  }
   0x4   :  { %4103 = vmatprep.subr.bf16.mxu0 %v4912_v0  ;;  %4127 = vmatprep.subr.bf16.mxu1 %v4912_v0  ;;  %v4768_v10 = vld [vmem:[%s6035_s0 + $0x18] sm:$0xff]   ;;  %v4769_v11 = vld [vmem:[%s6035_s0 + $0x40] sm:$0xff]   ;;  %v4771_v13 = vld [vmem:[%s6035_s0 + $0x48] sm:$0xff]   ;;  %vm3332_vm6 = vcmask 257024   ;;  %vm3328_vm7 = vcmask 1040384   ;;  %vm3516_vm8 = vcmask 64512  }
   0x5   :  { %v4770_v12 = vld [vmem:[%s6035_s0 + $0x20] sm:$0xff]   ;;  %v4772_v14 = vld [vmem:[%s6035_s0 + $0x50] sm:$0xff]   ;;  %v4773_v15 = vld [vmem:[%s6035_s0 + $0x78] sm:$0xff]   ;;  %vm3598_vm9 = vcmask 517120   ;;  %vm3644_vm10 = vcmask 1024  }
   0x6   :  { %v4774_v16 = vld [vmem:[%s6035_s0 + $0x58] sm:$0xff]   ;;  %v4775_v17 = vld [vmem:[%s6035_s0 + $0x80] sm:$0xff]   ;;  %v4777_v19 = vld [vmem:[%s6035_s0 + $0x88] sm:$0xff]  }
   0x7   :  { %4104 = vmatpush3.bf16.msra.mxu0 %v5002_v3  ;;  %4128 = vmatpush3.bf16.msra.mxu1 %v5002_v3  ;;  %v4776_v18 = vld [vmem:[%s6035_s0 + $0x60] sm:$0xff]   ;;  %v4778_v20 = vld [vmem:[%s6035_s0 + $0x68] sm:$0xff]   ;;  %v4779_v21 = vld [vmem:[%s6035_s0 + $0x90] sm:$0xff]  }
   0x8   :  { %4149 = vmatprep.subr.bf16.mxu0 %v4912_v0  ;;  %4173 = vmatprep.subr.bf16.mxu1 %v4912_v0  ;;  %v4780_v22 = vld [vmem:[%s6035_s0 + $0x70] sm:$0xff]   ;;  %v4781_v23 = vld [vmem:[%s6035_s0 + $0x98] sm:$0xff]   ;;  %v4782_v24 = vld [vmem:[%s6035_s0 + $0xa0] sm:$0xff]  }
   0x9   :  { %v4783_v25 = vld [vmem:[%s6035_s0 + $0xc8] sm:$0xff]   ;;  %v4785_v27 = vld [vmem:[%s6035_s0 + $0xd0] sm:$0xff]   ;;  %v4787_v29 = vld [vmem:[%s6035_s0 + $0xd8] sm:$0xff]  }
   0xa   :  { %4106 = vmatmul.mubr.msk.bf16.vlgmr.msra.gmra.mrb[0].mxu0 %vm91_vm2, %v4762_v4  ;;  %4130 = vmatmul.mubr.msk.bf16.vlgmr.msra.gmra.mrb[0].mxu1 %vm91_vm2, %v4763_v5  ;;  %v4784_v26 = vld [vmem:[%s6035_s0 + $0xa8] sm:$0xff]   ;;  %v4786_v28 = vld [vmem:[%s6035_s0 + $0xb0] sm:$0xff]   ;;  %v4788_v30 = vld [vmem:[%s6035_s0 + $0xb8] sm:$0xff]  }
   0xb   :  { %4150 = vmatpush3.bf16.msra.mxu0 %v4989_v1  ;;  %4109 = vmatprep.mubr.msk.bf16.mxu0 %vm4913_vm1, %v4912_v0  ;;  %v4789_v31 = vld [vmem:[%s6035_s0 + $0xe0] sm:$0xff]   ;;  %v4791_v33 = vld [vmem:[%s6035_s0 + $0xe8] sm:$0xff]   ;;  %v4792_v34 = vld [vmem:[%s6035_s0 + $0xf0] sm:$0xff]  }
   0xc   :  { %4133 = vmatprep.mubr.msk.bf16.mxu1 %vm4913_vm1, %v4912_v0  ;;  %4151 = vmatprep.subr.bf16.mxu0 %v4912_v0  ;;  %v4790_v32 = vld [vmem:[%s6035_s0 + $0xc0] sm:$0xff]   ;;  %v4793_v35 = vld [vmem:[%s6035_s0 + $0x118] sm:$0xff]   ;;  %v4797_v39 = vld [vmem:[%s6035_s0 + $0x128] sm:$0xff]  }
   0xd   :  { %4174 = vmatpush3.bf16.msra.mxu1 %v4989_v1  ;;  %v4794_v36 = vld [vmem:[%s6035_s0 + $0xf8] sm:$0xff]   ;;  %v4795_v37 = vld [vmem:[%s6035_s0 + $0x120] sm:$0xff]   ;;  %v4798_v40 = vld [vmem:[%s6035_s0 + $0x108] sm:$0xff]  }
   0xe   :  { %4175 = vmatprep.subr.bf16.mxu1 %v4912_v0  ;;  %v4796_v38 = vld [vmem:[%s6035_s0 + $0x100] sm:$0xff]   ;;  %v4799_v41 = vld [vmem:[%s6035_s0 + $0x130] sm:$0xff]   ;;  %v4801_v43 = vld [vmem:[%s6035_s0 + $0x138] sm:$0xff]  }
   0xf   :  { %4152 = vmatpush3.bf16.msra.mxu0 %v5002_v3  ;;  %v4800_v42 = vld [vmem:[%s6035_s0 + $0x110] sm:$0xff]   ;;  %v4802_v44 = vld [vmem:[%s6035_s0 + $0x140] sm:$0xff]   ;;  %v4803_v45 = vld [vmem:[%s6035_s0 + $0x168] sm:$0xff]  }
  0x10   :  { %4197 = vmatprep.subr.bf16.mxu0 %v4912_v0  ;;  %v4804_v46 = vld [vmem:[%s6035_s0 + $0x148] sm:$0xff]   ;;  %v4805_v47 = vld [vmem:[%s6035_s0 + $0x170] sm:$0xff]   ;;  %v4807_v49 = vld [vmem:[%s6035_s0 + $0x178] sm:$0xff]  }
  0x11   :  { %4176 = vmatpush3.bf16.msra.mxu1 %v5002_v3  ;;  %v4806_v48 = vld [vmem:[%s6035_s0 + $0x150] sm:$0xff]   ;;  %v4808_v50 = vld [vmem:[%s6035_s0 + $0x158] sm:$0xff]   ;;  %v4809_v51 = vld [vmem:[%s6035_s0 + $0x180] sm:$0xff]  }
  0x12   :  { %4110 = vmatmul.mubr.msk.bf16.gmra.mrb[4].mxu0 %vm91_vm2, %v4764_v6  ;;  %4134 = vmatmul.mubr.msk.bf16.gmra.mrb[4].mxu1 %vm91_vm2, %v4765_v7  ;;  %v4810_v52 = vld [vmem:[%s6035_s0 + $0x160] sm:$0xff]   ;;  %v4811_v53 = vld [vmem:[%s6035_s0 + $0x188] sm:$0xff]   ;;  %v4812_v54 = vld [vmem:[%s6035_s0 + $0x190] sm:$0xff]  }
  0x13   :  { %4113 = vmatprep.mubr.msk.bf16.mxu0 %vm4913_vm1, %v4912_v0  ;;  %4137 = vmatprep.mubr.msk.bf16.mxu1 %vm4913_vm1, %v4912_v0  ;;  %v4813_v55 = vld [vmem:[%s6035_s0 + $0x1b8] sm:$0xff]   ;;  %v4815_v57 = vld [vmem:[%s6035_s0 + $0x1c0] sm:$0xff]   ;;  %v4817_v62 = vld [vmem:[%s6035_s0 + $0x1c8] sm:$0xff]  }
  0x14   :  { %4221 = vmatprep.subr.bf16.mxu1 %v4912_v0  ;;  %v4814_v56 = vld [vmem:[%s6035_s0 + $0x198] sm:$0xff]   ;;  %v4816_v61 = vld [vmem:[%s6035_s0 + $0x1a0] sm:$0xff]  }
  0x1a   :  { %4114 = vmatmul.mubr.msk.bf16.gmra.mrb[8].mxu0 %vm91_vm2, %v4766_v8  ;;  %4138 = vmatmul.mubr.msk.bf16.gmra.mrb[8].mxu1 %vm91_vm2, %v4767_v9 }
  0x1b   :  { %4117 = vmatprep.mubr.msk.bf16.mxu0 %vm4913_vm1, %v4912_v0  ;;  %4141 = vmatprep.mubr.msk.bf16.mxu1 %vm4913_vm1, %v4912_v0 }
  0x22   :  { %4118 = vmatmul.mubr.msk.bf16.gmra.mrb[12].mxu0 %vm91_vm2, %v4768_v10  ;;  %4142 = vmatmul.mubr.msk.bf16.gmra.mrb[12].mxu1 %vm91_vm2, %v4769_v11  ;;  %v4818_v11 = vld [vmem:[%s6035_s0 + $0x1a8] sm:$0xff]  }
  0x23   :  { %4121 = vmatprep.mubr.msk.bf16.mxu0 %vm4913_vm1, %v4912_v0  ;;  %4145 = vmatprep.mubr.msk.bf16.mxu1 %vm4913_vm1, %v4912_v0 }
  0x2a   :  { %4122 = vmatmul.mubr.msk.bf16.gmra.mrb[16].mxu0 %vm91_vm2, %v4770_v12  ;;  %4146 = vmatmul.mubr.msk.bf16.gmra.mrb[16].mxu1 %vm91_vm2, %v4771_v13  ;;  %v4819_v12 = vld [vmem:[%s6035_s0 + $0x1d0] sm:$0xff]  }
  0x2b   :  { %4153 = vmatprep.mubr.msk.bf16.mxu0 %vm4913_vm1, %v4912_v0  ;;  %4177 = vmatprep.mubr.msk.bf16.mxu1 %vm4913_vm1, %v4912_v0 }
  0x32   :  { %4154 = vmatmul.mubr.msk.bf16.vlgmr.msra.gmra.mrb[20].mxu0 %vm91_vm2, %v4772_v14  ;;  %4178 = vmatmul.mubr.msk.bf16.vlgmr.msra.gmra.mrb[20].mxu1 %vm91_vm2, %v4773_v15 }
  0x33   :  { %4198 = vmatpush3.bf16.msra.mxu0 %v4989_v1  ;;  %4157 = vmatprep.mubr.msk.bf16.mxu0 %vm4913_vm1, %v4912_v0 }
  0x34   :  { %4181 = vmatprep.mubr.msk.bf16.mxu1 %vm4913_vm1, %v4912_v0  ;;  %4199 = vmatprep.subr.bf16.mxu0 %v4912_v0 }
  0x35   :  { %4222 = vmatpush3.bf16.msra.mxu1 %v4989_v1 }
  0x36   :  { %4223 = vmatprep.subr.bf16.mxu1 %v4912_v0 }
  0x37   :  { %4200 = vmatpush3.bf16.msra.mxu0 %v5002_v3 }
  0x38   :  { %4245 = vmatprep.subr.bf16.mxu0 %v4912_v0 }
  0x39   :  { %4224 = vmatpush3.bf16.msra.mxu1 %v5002_v3 }
  0x3a   :  { %4158 = vmatmul.mubr.msk.bf16.gmra.mrb[24].mxu0 %vm91_vm2, %v4774_v16  ;;  %4182 = vmatmul.mubr.msk.bf16.gmra.mrb[24].mxu1 %vm91_vm2, %v4775_v17 }
  0x3b   :  { %4161 = vmatprep.mubr.msk.bf16.mxu0 %vm4913_vm1, %v4912_v0  ;;  %4185 = vmatprep.mubr.msk.bf16.mxu1 %vm4913_vm1, %v4912_v0 }
  0x3c   :  { %4269 = vmatprep.subr.bf16.mxu1 %v4912_v0 }
  0x42   :  { %4162 = vmatmul.mubr.msk.bf16.gmra.mrb[28].mxu0 %vm91_vm2, %v4776_v18  ;;  %4186 = vmatmul.mubr.msk.bf16.gmra.mrb[28].mxu1 %vm91_vm2, %v4777_v19 }
  0x43   :  { %4165 = vmatprep.mubr.msk.bf16.mxu0 %vm4913_vm1, %v4912_v0  ;;  %4189 = vmatprep.mubr.msk.bf16.mxu1 %vm4913_vm1, %v4912_v0 }
  0x4a   :  { %4166 = vmatmul.mubr.msk.bf16.gmra.mrb[32].mxu0 %vm91_vm2, %v4778_v20  ;;  %4190 = vmatmul.mubr.msk.bf16.gmra.mrb[32].mxu1 %vm91_vm2, %v4779_v21  ;;  %v4820_v21 = vld [vmem:[%s6035_s0 + $0x1b0] sm:$0xff]  }
  0x4b   :  { %4169 = vmatprep.mubr.msk.bf16.mxu0 %vm4913_vm1, %v4912_v0  ;;  %4193 = vmatprep.mubr.msk.bf16.mxu1 %vm4913_vm1, %v4912_v0 }
  0x52   :  { %4170 = vmatmul.mubr.msk.bf16.gmra.mrb[36].mxu0 %vm91_vm2, %v4780_v22  ;;  %4194 = vmatmul.mubr.msk.bf16.gmra.mrb[36].mxu1 %vm91_vm2, %v4781_v23  ;;  %v4821_v22 = vld [vmem:[%s6035_s0 + $0x1d8] sm:$0xff]  }
  0x53   :  { %4201 = vmatprep.mubr.msk.bf16.mxu0 %vm4913_vm1, %v4912_v0  ;;  %4225 = vmatprep.mubr.msk.bf16.mxu1 %vm4913_vm1, %v4912_v0 }
  0x5a   :  { %4202 = vmatmul.mubr.msk.bf16.vlgmr.msra.gmra.mrb[40].mxu0 %vm91_vm2, %v4782_v24  ;;  %4226 = vmatmul.mubr.msk.bf16.vlgmr.msra.gmra.mrb[40].mxu1 %vm91_vm2, %v4783_v25 }
  0x5b   :  { %4246 = vmatpush3.bf16.msra.mxu0 %v4989_v1  ;;  %4205 = vmatprep.mubr.msk.bf16.mxu0 %vm4913_vm1, %v4912_v0 }
  0x5c   :  { %4229 = vmatprep.mubr.msk.bf16.mxu1 %vm4913_vm1, %v4912_v0  ;;  %4247 = vmatprep.subr.bf16.mxu0 %v4912_v0 }
  0x5d   :  { %4270 = vmatpush3.bf16.msra.mxu1 %v4989_v1 }
  0x5e   :  { %4271 = vmatprep.subr.bf16.mxu1 %v4912_v0 }
  0x5f   :  { %4248 = vmatpush3.bf16.msra.mxu0 %v5002_v3 }
  0x60   :  { %4293 = vmatprep.subr.bf16.mxu0 %v4912_v0 }
  0x61   :  { %4272 = vmatpush3.bf16.msra.mxu1 %v5002_v3 }
  0x62   :  { %4206 = vmatmul.mubr.msk.bf16.gmra.mrb[44].mxu0 %vm91_vm2, %v4784_v26  ;;  %4230 = vmatmul.mubr.msk.bf16.gmra.mrb[44].mxu1 %vm91_vm2, %v4785_v27 }
  0x63   :  { %4209 = vmatprep.mubr.msk.bf16.mxu0 %vm4913_vm1, %v4912_v0  ;;  %4233 = vmatprep.mubr.msk.bf16.mxu1 %vm4913_vm1, %v4912_v0 }
  0x64   :  { %4317 = vmatprep.subr.bf16.mxu1 %v4912_v0 }
  0x6a   :  { %4210 = vmatmul.mubr.msk.bf16.gmra.mrb[48].mxu0 %vm91_vm2, %v4786_v28  ;;  %4234 = vmatmul.mubr.msk.bf16.gmra.mrb[48].mxu1 %vm91_vm2, %v4787_v29 }
  0x6b   :  { %4213 = vmatprep.mubr.msk.bf16.mxu0 %vm4913_vm1, %v4912_v0  ;;  %4237 = vmatprep.mubr.msk.bf16.mxu1 %vm4913_vm1, %v4912_v0 }
  0x72   :  { %4214 = vmatmul.mubr.msk.bf16.gmra.mrb[52].mxu0 %vm91_vm2, %v4788_v30  ;;  %4238 = vmatmul.mubr.msk.bf16.gmra.mrb[52].mxu1 %vm91_vm2, %v4789_v31 }
  0x73   :  { %4217 = vmatprep.mubr.msk.bf16.mxu0 %vm4913_vm1, %v4912_v0  ;;  %4241 = vmatprep.mubr.msk.bf16.mxu1 %vm4913_vm1, %v4912_v0 }
  0x7a   :  { %4218 = vmatmul.mubr.msk.bf16.gmra.mrb[56].mxu0 %vm91_vm2, %v4790_v32  ;;  %4242 = vmatmul.mubr.msk.bf16.gmra.mrb[56].mxu1 %vm91_vm2, %v4791_v33 }
  0x7b   :  { %4249 = vmatprep.mubr.msk.bf16.mxu0 %vm4913_vm1, %v4912_v0  ;;  %4273 = vmatprep.mubr.msk.bf16.mxu1 %vm4913_vm1, %v4912_v0 }
  0x82   :  { %4250 = vmatmul.mubr.msk.bf16.vlgmr.msra.gmra.mrb[60].mxu0 %vm91_vm2, %v4792_v34  ;;  %4274 = vmatmul.mubr.msk.bf16.vlgmr.msra.gmra.mrb[60].mxu1 %vm91_vm2, %v4793_v35 }
  0x83   :  { %4294 = vmatpush3.bf16.msra.mxu0 %v4989_v1  ;;  %4253 = vmatprep.mubr.msk.bf16.mxu0 %vm4913_vm1, %v4912_v0 }
  0x84   :  { %4277 = vmatprep.mubr.msk.bf16.mxu1 %vm4913_vm1, %v4912_v0  ;;  %4295 = vmatprep.subr.bf16.mxu0 %v4912_v0 }
  0x85   :  { %4318 = vmatpush3.bf16.msra.mxu1 %v4989_v1 }
  0x86   :  { %4319 = vmatprep.subr.bf16.mxu1 %v4912_v0 }
  0x87   :  { %4296 = vmatpush3.bf16.msra.mxu0 %v5002_v3 }
  0x88   :  { %4341 = vmatprep.subr.bf16.mxu0 %v4912_v0 }
  0x89   :  { %4320 = vmatpush3.bf16.msra.mxu1 %v5002_v3 }
  0x8a   :  { %4254 = vmatmul.mubr.msk.bf16.gmra.mrb[64].mxu0 %vm91_vm2, %v4794_v36  ;;  %4278 = vmatmul.mubr.msk.bf16.gmra.mrb[64].mxu1 %vm91_vm2, %v4795_v37  ;;  %v4822_v36 = vld [vmem:[%s6035_s0 + $0x1e0] sm:$0xff]   ;;  %v4823_v37 = vld [vmem:[%s6035_s0 + $0x208] sm:$0xff]  }
  0x8b   :  { %4257 = vmatprep.mubr.msk.bf16.mxu0 %vm4913_vm1, %v4912_v0  ;;  %4281 = vmatprep.mubr.msk.bf16.mxu1 %vm4913_vm1, %v4912_v0 }
  0x8c   :  { %4365 = vmatprep.subr.bf16.mxu1 %v4912_v0 }
  0x92   :  { %4258 = vmatmul.mubr.msk.bf16.gmra.mrb[68].mxu0 %vm91_vm2, %v4796_v38  ;;  %4282 = vmatmul.mubr.msk.bf16.gmra.mrb[68].mxu1 %vm91_vm2, %v4797_v39 }
  0x93   :  { %4261 = vmatprep.mubr.msk.bf16.mxu0 %vm4913_vm1, %v4912_v0  ;;  %4285 = vmatprep.mubr.msk.bf16.mxu1 %vm4913_vm1, %v4912_v0 }
  0x9a   :  { %4262 = vmatmul.mubr.msk.bf16.gmra.mrb[72].mxu0 %vm91_vm2, %v4798_v40  ;;  %4286 = vmatmul.mubr.msk.bf16.gmra.mrb[72].mxu1 %vm91_vm2, %v4799_v41 }
  0x9b   :  { %4265 = vmatprep.mubr.msk.bf16.mxu0 %vm4913_vm1, %v4912_v0  ;;  %4289 = vmatprep.mubr.msk.bf16.mxu1 %vm4913_vm1, %v4912_v0 }
  0xa2   :  { %4266 = vmatmul.mubr.msk.bf16.gmra.mrb[76].mxu0 %vm91_vm2, %v4800_v42  ;;  %4290 = vmatmul.mubr.msk.bf16.gmra.mrb[76].mxu1 %vm91_vm2, %v4801_v43 }
  0xa3   :  { %4297 = vmatprep.mubr.msk.bf16.mxu0 %vm4913_vm1, %v4912_v0  ;;  %4321 = vmatprep.mubr.msk.bf16.mxu1 %vm4913_vm1, %v4912_v0 }
  0xaa   :  { %4298 = vmatmul.mubr.msk.bf16.vlgmr.msra.gmra.mrb[80].mxu0 %vm91_vm2, %v4802_v44  ;;  %4322 = vmatmul.mubr.msk.bf16.vlgmr.msra.gmra.mrb[80].mxu1 %vm91_vm2, %v4803_v45 }
  0xab   :  { %4342 = vmatpush3.bf16.msra.mxu0 %v4989_v1  ;;  %4301 = vmatprep.mubr.msk.bf16.mxu0 %vm4913_vm1, %v4912_v0 }
  0xac   :  { %4325 = vmatprep.mubr.msk.bf16.mxu1 %vm4913_vm1, %v4912_v0  ;;  %4343 = vmatprep.subr.bf16.mxu0 %v4912_v0 }
  0xad   :  { %4366 = vmatpush3.bf16.msra.mxu1 %v4989_v1 }
  0xae   :  { %4367 = vmatprep.subr.bf16.mxu1 %v4912_v0 }
  0xaf   :  { %4344 = vmatpush3.bf16.msra.mxu0 %v5002_v3 }
  0xb0   :  { %4389 = vmatprep.subr.bf16.mxu0 %v4912_v0 }
  0xb1   :  { %4368 = vmatpush3.bf16.msra.mxu1 %v5002_v3 }
  0xb2   :  { %4302 = vmatmul.mubr.msk.bf16.gmra.mrb[84].mxu0 %vm91_vm2, %v4804_v46  ;;  %4326 = vmatmul.mubr.msk.bf16.gmra.mrb[84].mxu1 %vm91_vm2, %v4805_v47 }
  0xb3   :  { %4305 = vmatprep.mubr.msk.bf16.mxu0 %vm4913_vm1, %v4912_v0  ;;  %4329 = vmatprep.mubr.msk.bf16.mxu1 %vm4913_vm1, %v4912_v0 }
  0xb4   :  { %4413 = vmatprep.subr.bf16.mxu1 %v4912_v0 }
  0xba   :  { %4306 = vmatmul.mubr.msk.bf16.gmra.mrb[88].mxu0 %vm91_vm2, %v4806_v48  ;;  %4330 = vmatmul.mubr.msk.bf16.gmra.mrb[88].mxu1 %vm91_vm2, %v4807_v49 }
  0xbb   :  { %4309 = vmatprep.mubr.msk.bf16.mxu0 %vm4913_vm1, %v4912_v0  ;;  %4333 = vmatprep.mubr.msk.bf16.mxu1 %vm4913_vm1, %v4912_v0 }
  0xc2   :  { %4310 = vmatmul.mubr.msk.bf16.gmra.mrb[92].mxu0 %vm91_vm2, %v4808_v50  ;;  %4334 = vmatmul.mubr.msk.bf16.gmra.mrb[92].mxu1 %vm91_vm2, %v4809_v51 }
  0xc3   :  { %4313 = vmatprep.mubr.msk.bf16.mxu0 %vm4913_vm1, %v4912_v0  ;;  %4337 = vmatprep.mubr.msk.bf16.mxu1 %vm4913_vm1, %v4912_v0 }
  0xca   :  { %4314 = vmatmul.mubr.msk.bf16.gmra.mrb[96].mxu0 %vm91_vm2, %v4810_v52  ;;  %4338 = vmatmul.mubr.msk.bf16.gmra.mrb[96].mxu1 %vm91_vm2, %v4811_v53  ;;  %v4824_v52 = vld [vmem:[%s6035_s0 + $0x1e8] sm:$0xff]  }
  0xcb   :  { %4345 = vmatprep.mubr.msk.bf16.mxu0 %vm4913_vm1, %v4912_v0  ;;  %4369 = vmatprep.mubr.msk.bf16.mxu1 %vm4913_vm1, %v4912_v0 }
  0xd2   :  { %4346 = vmatmul.mubr.msk.bf16.vlgmr.msra.gmra.mrb[100].mxu0 %vm91_vm2, %v4812_v54  ;;  %4370 = vmatmul.mubr.msk.bf16.vlgmr.msra.gmra.mrb[100].mxu1 %vm91_vm2, %v4813_v55 }
  0xd3   :  { %4390 = vmatpush3.bf16.msra.mxu0 %v4989_v1  ;;  %4349 = vmatprep.mubr.msk.bf16.mxu0 %vm4913_vm1, %v4912_v0 }
  0xd4   :  { %4373 = vmatprep.mubr.msk.bf16.mxu1 %vm4913_vm1, %v4912_v0  ;;  %4391 = vmatprep.subr.bf16.mxu0 %v4912_v0 }
  0xd5   :  { %4414 = vmatpush3.bf16.msra.mxu1 %v4989_v1 }
  0xd6   :  { %4415 = vmatprep.subr.bf16.mxu1 %v4912_v0 }
  0xd7   :  { %4392 = vmatpush3.bf16.msra.mxu0 %v5002_v3 }
  0xd8   :  { %4437 = vmatprep.subr.bf16.mxu0 %v4912_v0 }
  0xd9   :  { %4416 = vmatpush3.bf16.msra.mxu1 %v5002_v3 }
  0xda   :  { %4350 = vmatmul.mubr.msk.bf16.gmra.mrb[104].mxu0 %vm91_vm2, %v4814_v56  ;;  %4374 = vmatmul.mubr.msk.bf16.gmra.mrb[104].mxu1 %vm91_vm2, %v4815_v57 }
  0xdb   :  { %4353 = vmatprep.mubr.msk.bf16.mxu0 %vm4913_vm1, %v4912_v0  ;;  %4377 = vmatprep.mubr.msk.bf16.mxu1 %vm4913_vm1, %v4912_v0 }
  0xdc   :  { %4461 = vmatprep.subr.bf16.mxu1 %v4912_v0 }
  0xdd   :  { %v145_v58 = vpop.f32.mrb[0].mxu0  ;;  %v273_v59 = vpop.f32.mrb[0].mxu1 }
  0xde   :  { %v4107_v60 = vpop.f32.mrb[1].mxu0  ;;  %v4131_v63 = vpop.f32.mrb[1].mxu1 }
  0xdf   :  { %v148_v2 = vpop.f32.mrb[2].mxu0  ;;  %v276_v4 = vpop.f32.mrb[2].mxu1  ;;  %v4826_v63 = vld [vmem:[%s6035_s0 + $0x1f0] sm:$0xff]  }
  0xe0   :  { %v4108_v5 = vpop.f32.mrb[3].mxu0  ;;  %v4132_v6 = vpop.f32.mrb[3].mxu1 }
  0xe2   :  { %4354 = vmatmul.mubr.msk.bf16.gmra.mrb[108].mxu0 %vm91_vm2, %v4816_v61  ;;  %4378 = vmatmul.mubr.msk.bf16.gmra.mrb[108].mxu1 %vm91_vm2, %v4817_v62 }
  0xe3   :  { %4357 = vmatprep.mubr.msk.bf16.mxu0 %vm4913_vm1, %v4912_v0  ;;  %4381 = vmatprep.mubr.msk.bf16.mxu1 %vm4913_vm1, %v4912_v0 }
  0xe5   :  { %v153_v7 = vpop.f32.mrb[4].mxu0  ;;  %v281_v8 = vpop.f32.mrb[4].mxu1 }
  0xe6   :  { %v4111_v9 = vpop.f32.mrb[5].mxu0  ;;  %v4135_v10 = vpop.f32.mrb[5].mxu1 }
  0xe7   :  { %v156_v13 = vpop.f32.mrb[6].mxu0  ;;  %v284_v14 = vpop.f32.mrb[6].mxu1 }
  0xe8   :  { %v4112_v15 = vpop.f32.mrb[7].mxu0  ;;  %v4136_v16 = vpop.f32.mrb[7].mxu1 }
  0xea   :  { %4358 = vmatmul.mubr.msk.bf16.gmra.mrb[112].mxu0 %vm91_vm2, %v4818_v11  ;;  %4382 = vmatmul.mubr.msk.bf16.gmra.mrb[112].mxu1 %vm91_vm2, %v4819_v12  ;;  %v4828_v12 = vld [vmem:[%s6035_s0 + $0x1f8] sm:$0xff]  }
  0xeb   :  { %4361 = vmatprep.mubr.msk.bf16.mxu0 %vm4913_vm1, %v4912_v0  ;;  %4385 = vmatprep.mubr.msk.bf16.mxu1 %vm4913_vm1, %v4912_v0 }
  0xed   :  { %v161_v17 = vpop.f32.mrb[8].mxu0  ;;  %v289_v18 = vpop.f32.mrb[8].mxu1 }
  0xee   :  { %v4115_v19 = vpop.f32.mrb[9].mxu0  ;;  %v4139_v20 = vpop.f32.mrb[9].mxu1 }
  0xef   :  { %v164_v23 = vpop.f32.mrb[10].mxu0  ;;  %v292_v24 = vpop.f32.mrb[10].mxu1 }
  0xf0   :  { %v184_v25 = vmax.f32 %v145_v58, %v164_v23  ;;  %v312_v26 = vmax.f32 %v273_v59, %v292_v24  ;;  %v4116_v27 = vpop.f32.mrb[11].mxu0  ;;  %v4140_v28 = vpop.f32.mrb[11].mxu1  ;;  %v4830_v23 = vld [vmem:[%s6035_s0 + $0x200] sm:$0xff]   ;;  %v4831_v24 = vld [vmem:[%s6035_s0 + $0x228] sm:$0xff]  }
  0xf2   :  { %v5410_v29 = vmax.f32 %v184_v25, %v312_v26  ;;  %4362 = vmatmul.mubr.msk.bf16.gmra.mrb[116].mxu0 %vm91_vm2, %v4820_v21  ;;  %4386 = vmatmul.mubr.msk.bf16.gmra.mrb[116].mxu1 %vm91_vm2, %v4821_v22 }
  0xf3   :  { %4393 = vmatprep.mubr.msk.bf16.mxu0 %vm4913_vm1, %v4912_v0  ;;  %4417 = vmatprep.mubr.msk.bf16.mxu1 %vm4913_vm1, %v4912_v0 }
  0xf5   :  { %v169_v30 = vpop.f32.mrb[12].mxu0  ;;  %v297_v31 = vpop.f32.mrb[12].mxu1 }
  0xf6   :  { %v185_v32 = vmax.f32 %v148_v2, %v169_v30  ;;  %v313_v33 = vmax.f32 %v276_v4, %v297_v31  ;;  %v4119_v34 = vpop.f32.mrb[13].mxu0  ;;  %v4143_v35 = vpop.f32.mrb[13].mxu1  ;;  %v4827_v2 = vld [vmem:[%s6035_s0 + $0x218] sm:$0xff]  }
  0xf7   :  { %v172_v38 = vpop.f32.mrb[14].mxu0  ;;  %v300_v39 = vpop.f32.mrb[14].mxu1 }
  0xf8   :  { %v5424_v40 = vmax.f32 %v185_v32, %v313_v33  ;;  %v186_v41 = vmax.f32 %v153_v7, %v172_v38  ;;  %v314_v42 = vmax.f32 %v281_v8, %v300_v39  ;;  %v4120_v43 = vpop.f32.mrb[15].mxu0  ;;  %v4144_v44 = vpop.f32.mrb[15].mxu1  ;;  %v5487_v32 = vld [vmem:[#allocation2 + $0x30] sm:$0xff] }
  0xf9   :  { %v4832_v39 = vld [vmem:[%s6035_s0 + $0x230] sm:$0xff]  }
  0xfa   :  { %v5426_v45 = vmax.f32 %v186_v41, %v314_v42  ;;  %4394 = vmatmul.mubr.msk.bf16.vlgmr.msra.gmra.mrb[120].mxu0 %vm91_vm2, %v4822_v36  ;;  %4418 = vmatmul.mubr.msk.bf16.vlgmr.msra.gmra.mrb[120].mxu1 %vm91_vm2, %v4823_v37 }
  0xfb   :  { %4438 = vmatpush3.bf16.msra.mxu0 %v4989_v1  ;;  %4397 = vmatprep.mubr.msk.bf16.mxu0 %vm4913_vm1, %v4912_v0  ;;  %v4825_v1 = vld [vmem:[%s6035_s0 + $0x210] sm:$0xff]  }
  0xfc   :  { %4421 = vmatprep.mubr.msk.bf16.mxu1 %vm4913_vm1, %v4912_v0  ;;  %4439 = vmatprep.subr.bf16.mxu0 %v4912_v0 }
  0xfd   :  { %v177_v46 = vpop.f32.mrb[16].mxu0  ;;  %v305_v47 = vpop.f32.mrb[16].mxu1 }
  0xfe   :  { %v187_v48 = vmax.f32 %v156_v13, %v177_v46  ;;  %v315_v49 = vmax.f32 %v284_v14, %v305_v47  ;;  %v4123_v50 = vpop.f32.mrb[17].mxu0  ;;  %v4147_v51 = vpop.f32.mrb[17].mxu1  ;;  %v4829_v14 = vld [vmem:[%s6035_s0 + $0x220] sm:$0xff]  }
  0xff   :  { %v180_v53 = vpop.f32.mrb[18].mxu0  ;;  %v308_v54 = vpop.f32.mrb[18].mxu1  ;;  %4440 = vmatpush3.bf16.msra.mxu0 %v5002_v3 }
 0x100   :  { %v5443_v55 = vmax.f32 %v187_v48, %v315_v49  ;;  %v188_v56 = vmax.f32 %v161_v17, %v180_v53  ;;  %v316_v57 = vmax.f32 %v289_v18, %v308_v54  ;;  %v4124_v58 = vpop.f32.mrb[19].mxu0  ;;  %v4148_v59 = vpop.f32.mrb[19].mxu1  ;;  %4517 = vmatprep.subr.bf16.mxu0 %v4912_v0 }
 0x102   :  { %v5446_v60 = vmax.f32 %v188_v56, %v316_v57  ;;  %4398 = vmatmul.mubr.msk.bf16.gmra.mrb[124].mxu0 %vm91_vm2, %v4824_v52  ;;  %4422 = vmatmul.mubr.msk.bf16.gmra.mrb[124].mxu1 %vm91_vm2, %v4825_v1  ;;  %v4833_v57 = vld [vmem:[%s6035_s0 + $0x238] sm:$0xff]  }
 0x103   :  { %4401 = vmatprep.mubr.msk.bf16.mxu0 %vm4913_vm1, %v4912_v0  ;;  %4425 = vmatprep.mubr.msk.bf16.mxu1 %vm4913_vm1, %v4912_v0 }
 0x105   :  { %v406_v3 = vpop.f32.mrb[20].mxu0  ;;  %v539_v61 = vpop.f32.mrb[20].mxu1 }
 0x106   :  { %v4155_v62 = vpop.f32.mrb[21].mxu0  ;;  %v4179_v4 = vpop.f32.mrb[21].mxu1 }
 0x107   :  { %v409_v5 = vpop.f32.mrb[22].mxu0  ;;  %v542_v6 = vpop.f32.mrb[22].mxu1 }
 0x108   :  { %v4156_v7 = vpop.f32.mrb[23].mxu0  ;;  %v4180_v8 = vpop.f32.mrb[23].mxu1 }
 0x10a   :  { %4402 = vmatmul.mubr.msk.bf16.gmra.mrb[128].mxu0 %vm91_vm2, %v4826_v63  ;;  %4426 = vmatmul.mubr.msk.bf16.gmra.mrb[128].mxu1 %vm91_vm2, %v4827_v2 }
 0x10b   :  { %4405 = vmatprep.mubr.msk.bf16.mxu0 %vm4913_vm1, %v4912_v0  ;;  %4429 = vmatprep.mubr.msk.bf16.mxu1 %vm4913_vm1, %v4912_v0 }
 0x10d   :  { %v414_v9 = vpop.f32.mrb[24].mxu0  ;;  %v547_v10 = vpop.f32.mrb[24].mxu1 }
 0x10e   :  { %v4159_v11 = vpop.f32.mrb[25].mxu0  ;;  %v4183_v13 = vpop.f32.mrb[25].mxu1 }
 0x10f   :  { %v417_v15 = vpop.f32.mrb[26].mxu0  ;;  %v550_v16 = vpop.f32.mrb[26].mxu1 }
 0x110   :  { %v4160_v17 = vpop.f32.mrb[27].mxu0  ;;  %v4184_v18 = vpop.f32.mrb[27].mxu1 }
 0x112   :  { %4406 = vmatmul.mubr.msk.bf16.gmra.mrb[132].mxu0 %vm91_vm2, %v4828_v12  ;;  %4430 = vmatmul.mubr.msk.bf16.gmra.mrb[132].mxu1 %vm91_vm2, %v4829_v14 }
 0x113   :  { %4409 = vmatprep.mubr.msk.bf16.mxu0 %vm4913_vm1, %v4912_v0  ;;  %4433 = vmatprep.mubr.msk.bf16.mxu1 %vm4913_vm1, %v4912_v0 }
 0x115   :  { %v422_v19 = vpop.f32.mrb[28].mxu0  ;;  %v555_v20 = vpop.f32.mrb[28].mxu1 }
 0x116   :  { %v4163_v21 = vpop.f32.mrb[29].mxu0  ;;  %v4187_v22 = vpop.f32.mrb[29].mxu1 }
 0x117   :  { %v425_v25 = vpop.f32.mrb[30].mxu0  ;;  %v558_v26 = vpop.f32.mrb[30].mxu1 }
 0x118   :  { %v445_v27 = vmax.f32 %v406_v3, %v425_v25  ;;  %v4164_v28 = vpop.f32.mrb[31].mxu0  ;;  %v578_v30 = vmax.f32 %v539_v61, %v558_v26  ;;  %v4188_v31 = vpop.f32.mrb[31].mxu1  ;;  %v4836_v26 = vld [vmem:[%s6035_s0 + $0x250] sm:$0xff]  }
 0x11a   :  { %v450_v0 = vmax.f32 %v5410_v29, %v445_v27  ;;  %4410 = vmatmul.mubr.msk.bf16.gmra.mrb[136].mxu0 %vm91_vm2, %v4830_v23  ;;  %4434 = vmatmul.mubr.msk.bf16.gmra.mrb[136].mxu1 %vm91_vm2, %v4831_v24 }
 0x11b   :  { %4441 = vmatprep.mubr.msk.bf16.mxu0 %vm4913_vm1, %v5487_v32  ;;  %4477 = vmatprep.mubr.msk.bf16.mxu1 %vm4913_vm1, %v5487_v32 }
 0x11c   :  { %v5493_v33 = vmax.f32 %v450_v0, %v578_v30 }
 0x11d   :  { %v430_v34 = vpop.f32.mrb[32].mxu0  ;;  %v563_v35 = vpop.f32.mrb[32].mxu1 }
 0x11e   :  { %v446_v36 = vmax.f32 %v409_v5, %v430_v34  ;;  %v4167_v37 = vpop.f32.mrb[33].mxu0  ;;  %v579_v38 = vmax.f32 %v542_v6, %v563_v35  ;;  %v4191_v29 = vpop.f32.mrb[33].mxu1 }
 0x11f   :  { %v433_v41 = vpop.f32.mrb[34].mxu0  ;;  %v566_v42 = vpop.f32.mrb[34].mxu1 }
 0x120   :  { %v451_v43 = vmax.f32 %v5424_v40, %v446_v36  ;;  %v447_v44 = vmax.f32 %v414_v9, %v433_v41  ;;  %v4168_v46 = vpop.f32.mrb[35].mxu0  ;;  %v580_v47 = vmax.f32 %v547_v10, %v566_v42  ;;  %v4192_v48 = vpop.f32.mrb[35].mxu1 }
 0x122   :  { %v452_v49 = vmax.f32 %v5426_v45, %v447_v44  ;;  %v5500_v50 = vmax.f32 %v451_v43, %v579_v38  ;;  %4442 = vmatmul.mubr.msk.bf16.vlgmr.msra.gmra.mrb[140].mxu0 %vm91_vm2, %v4832_v39 }
 0x123   :  { %4445 = vmatprep.mubr.msk.bf16.mxu0 %vm4913_vm1, %v5487_v32 }
 0x124   :  { %v5505_v51 = vmax.f32 %v452_v49, %v580_v47 }
 0x125   :  { %v438_v52 = vpop.f32.mrb[36].mxu0  ;;  %v571_v1 = vpop.f32.mrb[36].mxu1 }
 0x126   :  { %v448_v53 = vmax.f32 %v417_v15, %v438_v52  ;;  %v4171_v54 = vpop.f32.mrb[37].mxu0  ;;  %v581_v40 = vmax.f32 %v550_v16, %v571_v1  ;;  %v4195_v56 = vpop.f32.mrb[37].mxu1  ;;  %v4835_v16 = vld [vmem:[%s6035_s0 + $0x248] sm:$0xff]  }
 0x127   :  { %v441_v45 = vpop.f32.mrb[38].mxu0  ;;  %v574_v58 = vpop.f32.mrb[38].mxu1 }
 0x128   :  { %v453_v59 = vmax.f32 %v5443_v55, %v448_v53  ;;  %v449_v3 = vmax.f32 %v422_v19, %v441_v45  ;;  %v4172_v61 = vpop.f32.mrb[39].mxu0  ;;  %v582_v62 = vmax.f32 %v555_v20, %v574_v58  ;;  %v4196_v63 = vpop.f32.mrb[39].mxu1  ;;  %v4834_v55 = vld [vmem:[%s6035_s0 + $0x240] sm:$0xff]  }
 0x12a   :  { %v454_v2 = vmax.f32 %v5446_v60, %v449_v3  ;;  %v5512_v4 = vmax.f32 %v453_v59, %v581_v40  ;;  %4446 = vmatmul.mubr.msk.bf16.gmra.mrb[144].mxu0 %vm91_vm2, %v4833_v57 }
 0x12b   :  { %4449 = vmatprep.mubr.msk.bf16.mxu0 %vm4913_vm1, %v5487_v32 }
 0x12c   :  { %v5517_v5 = vmax.f32 %v454_v2, %v582_v62 }
 0x12d   :  { %v672_v6 = vpop.f32.mrb[40].mxu0  ;;  %v805_v7 = vpop.f32.mrb[40].mxu1 }
 0x12e   :  { %v4203_v8 = vpop.f32.mrb[41].mxu0  ;;  %v4227_v9 = vpop.f32.mrb[41].mxu1 }
 0x12f   :  { %v675_v10 = vpop.f32.mrb[42].mxu0  ;;  %v808_v11 = vpop.f32.mrb[42].mxu1 }
 0x130   :  { %v4204_v60 = vpop.f32.mrb[43].mxu0  ;;  %v4228_v12 = vpop.f32.mrb[43].mxu1 }
 0x132   :  { %4450 = vmatmul.mubr.msk.bf16.gmra.mrb[148].mxu0 %vm91_vm2, %v4834_v55 }
 0x133   :  { %4453 = vmatprep.mubr.msk.bf16.mxu0 %vm4913_vm1, %v5487_v32 }
 0x135   :  { %v680_v13 = vpop.f32.mrb[44].mxu0  ;;  %v813_v14 = vpop.f32.mrb[44].mxu1 }
 0x136   :  { %v4207_v15 = vpop.f32.mrb[45].mxu0  ;;  %v4231_v17 = vpop.f32.mrb[45].mxu1 }
 0x137   :  { %v683_v18 = vpop.f32.mrb[46].mxu0  ;;  %v816_v19 = vpop.f32.mrb[46].mxu1 }
 0x138   :  { %v4208_v20 = vpop.f32.mrb[47].mxu0  ;;  %v4232_v21 = vpop.f32.mrb[47].mxu1 }
 0x13a   :  { %4454 = vmatmul.mubr.msk.bf16.gmra.mrb[152].mxu0 %vm91_vm2, %v4835_v16 }
 0x13b   :  { %4457 = vmatprep.mubr.msk.bf16.mxu0 %vm4913_vm1, %v5487_v32 }
 0x13d   :  { %v688_v22 = vpop.f32.mrb[48].mxu0  ;;  %v821_v23 = vpop.f32.mrb[48].mxu1 }
 0x13e   :  { %v4211_v24 = vpop.f32.mrb[49].mxu0  ;;  %v4235_v25 = vpop.f32.mrb[49].mxu1 }
 0x13f   :  { %v691_v27 = vpop.f32.mrb[50].mxu0  ;;  %v824_v28 = vpop.f32.mrb[50].mxu1 }
 0x140   :  { %v711_v30 = vmax.f32 %v672_v6, %v691_v27  ;;  %v4212_v31 = vpop.f32.mrb[51].mxu0  ;;  %v844_v0 = vmax.f32 %v805_v7, %v824_v28  ;;  %v4236_v34 = vpop.f32.mrb[51].mxu1 }
 0x142   :  { %v716_v35 = vmax.f32 %v5493_v33, %v711_v30  ;;  %4458 = vmatmul.mubr.msk.bf16.gmra.mrb[156].mxu0 %vm91_vm2, %v4836_v26 }
 0x143   :  { %4533 = vmatprep.mubr.msk.bf16.mxu0 %vm4913_vm1, %v5487_v32 }
 0x144   :  { %v849_v36 = vmax.f32 %v716_v35, %v844_v0 }
 0x145   :  { %v696_v37 = vpop.f32.mrb[52].mxu0  ;;  %v829_v38 = vpop.f32.mrb[52].mxu1 }
 0x146   :  { %v712_v29 = vmax.f32 %v675_v10, %v696_v37  ;;  %v4215_v39 = vpop.f32.mrb[53].mxu0  ;;  %v845_v41 = vmax.f32 %v808_v11, %v829_v38  ;;  %v4239_v42 = vpop.f32.mrb[53].mxu1 }
 0x147   :  { %v699_v43 = vpop.f32.mrb[54].mxu0  ;;  %v832_v44 = vpop.f32.mrb[54].mxu1 }
 0x148   :  { %v717_v46 = vmax.f32 %v5500_v50, %v712_v29  ;;  %v713_v47 = vmax.f32 %v680_v13, %v699_v43  ;;  %v4216_v48 = vpop.f32.mrb[55].mxu0  ;;  %v846_v49 = vmax.f32 %v813_v14, %v832_v44  ;;  %v4240_v33 = vpop.f32.mrb[55].mxu1 }
 0x14a   :  { %v718_v52 = vmax.f32 %v5505_v51, %v713_v47  ;;  %v850_v1 = vmax.f32 %v717_v46, %v845_v41 }
 0x14c   :  { %v851_v53 = vmax.f32 %v718_v52, %v846_v49 }
 0x14d   :  { %v704_v54 = vpop.f32.mrb[56].mxu0  ;;  %v837_v40 = vpop.f32.mrb[56].mxu1 }
 0x14e   :  { %v714_v56 = vmax.f32 %v683_v18, %v704_v54  ;;  %v4219_v57 = vpop.f32.mrb[57].mxu0  ;;  %v847_v45 = vmax.f32 %v816_v19, %v837_v40  ;;  %v4243_v58 = vpop.f32.mrb[57].mxu1 }
 0x14f   :  { %v707_v59 = vpop.f32.mrb[58].mxu0  ;;  %v840_v3 = vpop.f32.mrb[58].mxu1 }
 0x150   :  { %v719_v61 = vmax.f32 %v5512_v4, %v714_v56  ;;  %v715_v62 = vmax.f32 %v688_v22, %v707_v59  ;;  %v4220_v50 = vpop.f32.mrb[59].mxu0  ;;  %v848_v63 = vmax.f32 %v821_v23, %v840_v3  ;;  %v4244_v2 = vpop.f32.mrb[59].mxu1 }
 0x152   :  { %v720_v6 = vmax.f32 %v5517_v5, %v715_v62  ;;  %v852_v7 = vmax.f32 %v719_v61, %v847_v45 }
 0x154   :  { %v853_v51 = vmax.f32 %v720_v6, %v848_v63 }
 0x155   :  { %v938_v8 = vpop.f32.mrb[60].mxu0  ;;  %v1071_v55 = vpop.f32.mrb[60].mxu1 }
 0x156   :  { %v4251_v9 = vpop.f32.mrb[61].mxu0  ;;  %v4275_v10 = vpop.f32.mrb[61].mxu1 }
 0x157   :  { %v941_v11 = vpop.f32.mrb[62].mxu0  ;;  %v1074_v60 = vpop.f32.mrb[62].mxu1  ;;  %v4838_v10 = vld [vmem:[%s6036_s4 + $0x48] sm:$0xff]  }
 0x158   :  { %v4252_v12 = vpop.f32.mrb[63].mxu0  ;;  %v4276_v13 = vpop.f32.mrb[63].mxu1 }
 0x15d   :  { %v946_v14 = vpop.f32.mrb[64].mxu0  ;;  %v1079_v15 = vpop.f32.mrb[64].mxu1 }
 0x15e   :  { %v4255_v16 = vpop.f32.mrb[65].mxu0  ;;  %v4279_v4 = vpop.f32.mrb[65].mxu1 }
 0x15f   :  { %v949_v17 = vpop.f32.mrb[66].mxu0  ;;  %v1082_v18 = vpop.f32.mrb[66].mxu1 }
 0x160   :  { %v4256_v19 = vpop.f32.mrb[67].mxu0  ;;  %v4280_v20 = vpop.f32.mrb[67].mxu1 }
 0x161   :  { %v4843_v19 = vld [vmem:[%s6036_s4 + $0x90] sm:$0xff]  }
 0x165   :  { %v954_v21 = vpop.f32.mrb[68].mxu0  ;;  %v1087_v5 = vpop.f32.mrb[68].mxu1 }
 0x166   :  { %v4259_v22 = vpop.f32.mrb[69].mxu0  ;;  %v4283_v23 = vpop.f32.mrb[69].mxu1 }
 0x167   :  { %v957_v24 = vpop.f32.mrb[70].mxu0  ;;  %v1090_v25 = vpop.f32.mrb[70].mxu1  ;;  %v4842_v23 = vld [vmem:[%s6036_s4 + $0x58] sm:$0xff]  }
 0x168   :  { %v977_v26 = vmax.f32 %v938_v8, %v957_v24  ;;  %v4260_v27 = vpop.f32.mrb[71].mxu0  ;;  %v1110_v28 = vmax.f32 %v1071_v55, %v1090_v25  ;;  %v4284_v30 = vpop.f32.mrb[71].mxu1  ;;  %v4844_v24 = vld [vmem:[%s6036_s4 + $0x98] sm:$0xff]  }
 0x169   :  { %v4845_v30 = vld [vmem:[%s6036_s4 + $0x60] sm:$0xff]  }
 0x16a   :  { %v982_v31 = vmax.f32 %v849_v36, %v977_v26 }
 0x16c   :  { %v5542_v0 = vmax.f32 %v982_v31, %v1110_v28  ;;  %v4846_v31 = vld [vmem:[%s6036_s4 + $0xa0] sm:$0xff]  }
 0x16d   :  { %v962_v34 = vpop.f32.mrb[72].mxu0  ;;  %v1095_v35 = vpop.f32.mrb[72].mxu1 }
 0x16e   :  { %v978_v37 = vmax.f32 %v941_v11, %v962_v34  ;;  %v4263_v38 = vpop.f32.mrb[73].mxu0  ;;  %v1111_v29 = vmax.f32 %v1074_v60, %v1095_v35  ;;  %v4287_v39 = vpop.f32.mrb[73].mxu1  ;;  %v4839_v11 = vld [vmem:[%s6036_s4 + $0x80] sm:$0xff]  }
 0x16f   :  { %v965_v41 = vpop.f32.mrb[74].mxu0  ;;  %v1098_v42 = vpop.f32.mrb[74].mxu1  ;;  %4518 = vmatpush3.bf16.msra.mxu0 %v4839_v11 }
 0x170   :  { %v983_v43 = vmax.f32 %v850_v1, %v978_v37  ;;  %v979_v44 = vmax.f32 %v946_v14, %v965_v41  ;;  %v4264_v46 = vpop.f32.mrb[75].mxu0  ;;  %v1112_v47 = vmax.f32 %v1079_v15, %v1098_v42  ;;  %v4288_v48 = vpop.f32.mrb[75].mxu1  ;;  %v4840_v14 = vld [vmem:[%s6036_s4 + $0x50] sm:$0xff]   ;;  %v4841_v15 = vld [vmem:[%s6036_s4 + $0x88] sm:$0xff]   ;;  %4519 = vmatprep.subr.bf16.mxu0 %v5487_v32 }
 0x171   :  { %v4847_v42 = vld [vmem:[%s6036_s4 + $0x68] sm:$0xff]  }
 0x172   :  { %v984_v49 = vmax.f32 %v851_v53, %v979_v44  ;;  %v5544_v33 = vmax.f32 %v983_v43, %v1111_v29  ;;  %v4837_v53 = vld [vmem:[%s6036_s4 + $0x40] sm:$0xff]   ;;  %v4848_v43 = vld [vmem:[%s6036_s4 + $0xa8] sm:$0xff]  }
 0x173   :  { %4462 = vmatpush3.bf16.msra.mxu1 %v4837_v53  ;;  %4520 = vmatpush3.bf16.msra.mxu0 %v4841_v15 }
 0x174   :  { %v5546_v52 = vmax.f32 %v984_v49, %v1112_v47  ;;  %4463 = vmatprep.subr.bf16.mxu1 %v5487_v32  ;;  %4521 = vmatprep.subr.bf16.mxu0 %v5487_v32 }
 0x175   :  { %v970_v36 = vpop.f32.mrb[76].mxu0  ;;  %v1103_v54 = vpop.f32.mrb[76].mxu1 }
 0x176   :  { %v980_v40 = vmax.f32 %v949_v17, %v970_v36  ;;  %v4267_v56 = vpop.f32.mrb[77].mxu0  ;;  %v1113_v57 = vmax.f32 %v1082_v18, %v1103_v54  ;;  %v4291_v45 = vpop.f32.mrb[77].mxu1  ;;  %v4849_v54 = vld [vmem:[%s6036_s4 + $0x70] sm:$0xff]  }
 0x177   :  { %v973_v58 = vpop.f32.mrb[78].mxu0  ;;  %v1106_v59 = vpop.f32.mrb[78].mxu1  ;;  %4464 = vmatpush3.bf16.msra.mxu1 %v4838_v10  ;;  %4522 = vmatpush3.bf16.msra.mxu0 %v4843_v19 }
 0x178   :  { %v985_v3 = vmax.f32 %v852_v7, %v980_v40  ;;  %v981_v61 = vmax.f32 %v954_v21, %v973_v58  ;;  %v4268_v1 = vpop.f32.mrb[79].mxu0  ;;  %v1114_v62 = vmax.f32 %v1087_v5, %v1106_v59  ;;  %v4292_v50 = vpop.f32.mrb[79].mxu1  ;;  %4465 = vmatprep.subr.bf16.mxu1 %v5487_v32  ;;  %4523 = vmatprep.subr.bf16.mxu0 %v5487_v32  ;;  %v4850_v40 = vld [vmem:[%s6036_s4 + $0xb0] sm:$0xff]  }
 0x179   :  { %v4851_v50 = vld [vmem:[%s6036_s4 + $0x78] sm:$0xff]  }
 0x17a   :  { %v986_v63 = vmax.f32 %v853_v51, %v981_v61  ;;  %v5551_v2 = vmax.f32 %v985_v3, %v1113_v57 }
 0x17b   :  { %4466 = vmatpush3.bf16.msra.mxu1 %v4840_v14  ;;  %4524 = vmatpush3.bf16.msra.mxu0 %v4844_v24 }
 0x17c   :  { %v5553_v6 = vmax.f32 %v986_v63, %v1114_v62  ;;  %4467 = vmatprep.subr.bf16.mxu1 %v5487_v32  ;;  %4525 = vmatprep.subr.bf16.mxu0 %v5487_v32 }
 0x17d   :  { %v1204_v8 = vpop.f32.mrb[80].mxu0  ;;  %v1337_v55 = vpop.f32.mrb[80].mxu1 }
 0x17e   :  { %v4299_v9 = vpop.f32.mrb[81].mxu0  ;;  %v4323_v7 = vpop.f32.mrb[81].mxu1 }
 0x17f   :  { %v5562_v51 = vpop.f32.mrb[82].mxu0  ;;  %v5564_v60 = vpop.f32.mrb[82].mxu1  ;;  %4468 = vmatpush3.bf16.msra.mxu1 %v4842_v23  ;;  %4526 = vmatpush3.bf16.msra.mxu0 %v4846_v31 }
 0x180   :  { %v4300_v12 = vpop.f32.mrb[83].mxu0  ;;  %v4324_v13 = vpop.f32.mrb[83].mxu1  ;;  %4469 = vmatprep.subr.bf16.mxu1 %v5487_v32  ;;  %4527 = vmatprep.subr.bf16.mxu0 %v5487_v32 }
 0x183   :  { %4470 = vmatpush3.bf16.msra.mxu1 %v4845_v30  ;;  %4528 = vmatpush3.bf16.msra.mxu0 %v4848_v43 }
 0x184   :  { %4471 = vmatprep.subr.bf16.mxu1 %v5487_v32  ;;  %4529 = vmatprep.subr.bf16.mxu0 %v5487_v32 }
 0x185   :  { %v5574_v16 = vpop.f32.mrb[84].mxu0  ;;  %v5576_v4 = vpop.f32.mrb[84].mxu1 }
 0x186   :  { %v4303_v17 = vpop.f32.mrb[85].mxu0  ;;  %v4327_v18 = vpop.f32.mrb[85].mxu1 }
 0x187   :  { %v5583_v20 = vpop.f32.mrb[86].mxu0  ;;  %v5585_v21 = vpop.f32.mrb[86].mxu1  ;;  %4472 = vmatpush3.bf16.msra.mxu1 %v4847_v42  ;;  %4530 = vmatpush3.bf16.msra.mxu0 %v4850_v40 }
 0x188   :  { %v4304_v5 = vpop.f32.mrb[87].mxu0  ;;  %v4328_v22 = vpop.f32.mrb[87].mxu1  ;;  %4473 = vmatprep.subr.bf16.mxu1 %v5487_v32  ;;  %4531 = vmatprep.subr.bf16.mxu0 %v5487_v32 }
 0x18b   :  { %4474 = vmatpush3.bf16.msra.mxu1 %v4849_v54 }
 0x18c   :  { %4475 = vmatprep.subr.bf16.mxu1 %v5487_v32 }
 0x18d   :  { %v5594_v25 = vpop.f32.mrb[88].mxu0  ;;  %v5596_v26 = vpop.f32.mrb[88].mxu1 }
 0x18e   :  { %v4307_v27 = vpop.f32.mrb[89].mxu0  ;;  %v4331_v28 = vpop.f32.mrb[89].mxu1 }
 0x18f   :  { %v1223_v34 = vpop.f32.mrb[90].mxu0  ;;  %v1356_v35 = vpop.f32.mrb[90].mxu1  ;;  %4476 = vmatpush3.bf16.msra.mxu1 %v4851_v50 }
 0x190   :  { %v1243_v37 = vmax.f32 %v1204_v8, %v1223_v34  ;;  %v4308_v38 = vpop.f32.mrb[91].mxu0  ;;  %v1376_v29 = vmax.f32 %v1337_v55, %v1356_v35  ;;  %v4332_v39 = vpop.f32.mrb[91].mxu1  ;;  %4489 = vmatprep.subr.bf16.mxu1 %v5487_v32 }
 0x192   :  { %v1248_v41 = vmax.f32 %v5542_v0, %v1243_v37 }
 0x194   :  { %v5615_v44 = vmax.f32 %v1248_v41, %v1376_v29 }
 0x195   :  { %v1228_v46 = vpop.f32.mrb[92].mxu0  ;;  %v1361_v47 = vpop.f32.mrb[92].mxu1 }
 0x196   :  { %v1244_v0 = vmax.f32 %v5562_v51, %v1228_v46  ;;  %v4311_v48 = vpop.f32.mrb[93].mxu0  ;;  %v1377_v49 = vmax.f32 %v5564_v60, %v1361_v47  ;;  %v4335_v36 = vpop.f32.mrb[93].mxu1 }
 0x197   :  { %v1231_v56 = vpop.f32.mrb[94].mxu0  ;;  %v1364_v57 = vpop.f32.mrb[94].mxu1 }
 0x198   :  { %v1249_v45 = vmax.f32 %v5544_v33, %v1244_v0  ;;  %v1245_v58 = vmax.f32 %v5574_v16, %v1231_v56  ;;  %v4312_v59 = vpop.f32.mrb[95].mxu0  ;;  %v1378_v3 = vmax.f32 %v5576_v4, %v1364_v57  ;;  %v4336_v61 = vpop.f32.mrb[95].mxu1  ;;  %v4852_v33 = vld [vmem:[%s6036_s4 + $0xb8] sm:$0xff]  }
 0x199   :  { %4532 = vmatpush3.bf16.msra.mxu0 %v4852_v33 }
 0x19a   :  { %v1250_v1 = vmax.f32 %v5546_v52, %v1245_v58  ;;  %v1382_v62 = vmax.f32 %v1249_v45, %v1377_v49  ;;  %4573 = vmatprep.subr.bf16.mxu0 %v5487_v32 }
 0x19c   :  { %v1383_v53 = vmax.f32 %v1250_v1, %v1378_v3 }
 0x19d   :  { %v1236_v63 = vpop.f32.mrb[96].mxu0  ;;  %v1369_v8 = vpop.f32.mrb[96].mxu1 }
 0x19e   :  { %v1246_v52 = vmax.f32 %v5583_v20, %v1236_v63  ;;  %v4315_v55 = vpop.f32.mrb[97].mxu0  ;;  %v1379_v9 = vmax.f32 %v5585_v21, %v1369_v8  ;;  %v4339_v7 = vpop.f32.mrb[97].mxu1 }
 0x19f   :  { %v1239_v10 = vpop.f32.mrb[98].mxu0  ;;  %v1372_v11 = vpop.f32.mrb[98].mxu1 }
 0x1a0   :  { %v1251_v51 = vmax.f32 %v5551_v2, %v1246_v52  ;;  %v1247_v60 = vmax.f32 %v5594_v25, %v1239_v10  ;;  %v4316_v12 = vpop.f32.mrb[99].mxu0  ;;  %v1380_v13 = vmax.f32 %v5596_v26, %v1372_v11  ;;  %v4340_v14 = vpop.f32.mrb[99].mxu1 }
 0x1a2   :  { %v1252_v15 = vmax.f32 %v5553_v6, %v1247_v60  ;;  %v1384_v16 = vmax.f32 %v1251_v51, %v1379_v9 }
 0x1a4   :  { %v1385_v32 = vmax.f32 %v1252_v15, %v1380_v13 }
 0x1a5   :  { %v1470_v4 = vpop.f32.mrb[100].mxu0  ;;  %v1603_v17 = vpop.f32.mrb[100].mxu1 }
 0x1a6   :  { %v4347_v18 = vpop.f32.mrb[101].mxu0  ;;  %v4371_v19 = vpop.f32.mrb[101].mxu1 }
 0x1a7   :  { %v1473_v20 = vpop.f32.mrb[102].mxu0  ;;  %v1606_v21 = vpop.f32.mrb[102].mxu1 }
 0x1a8   :  { %v4348_v5 = vpop.f32.mrb[103].mxu0  ;;  %v4372_v22 = vpop.f32.mrb[103].mxu1 }
 0x1ad   :  { %v1478_v23 = vpop.f32.mrb[104].mxu0  ;;  %v1611_v2 = vpop.f32.mrb[104].mxu1 }
 0x1ae   :  { %v4351_v24 = vpop.f32.mrb[105].mxu0  ;;  %v4375_v25 = vpop.f32.mrb[105].mxu1 }
 0x1af   :  { %v1481_v27 = vpop.f32.mrb[106].mxu0  ;;  %v1614_v28 = vpop.f32.mrb[106].mxu1 }
 0x1b0   :  { %v4352_v26 = vpop.f32.mrb[107].mxu0  ;;  %v4376_v30 = vpop.f32.mrb[107].mxu1 }
 0x1b5   :  { %v1486_v31 = vpop.f32.mrb[108].mxu0  ;;  %v1619_v6 = vpop.f32.mrb[108].mxu1 }
 0x1b6   :  { %v4355_v34 = vpop.f32.mrb[109].mxu0  ;;  %v4379_v35 = vpop.f32.mrb[109].mxu1 }
 0x1b7   :  { %v1489_v37 = vpop.f32.mrb[110].mxu0  ;;  %v1622_v38 = vpop.f32.mrb[110].mxu1 }
 0x1b8   :  { %v1509_v29 = vmax.f32 %v1470_v4, %v1489_v37  ;;  %v4356_v39 = vpop.f32.mrb[111].mxu0  ;;  %v1642_v41 = vmax.f32 %v1603_v17, %v1622_v38  ;;  %v4380_v42 = vpop.f32.mrb[111].mxu1 }
 0x1ba   :  { %v1514_v43 = vmax.f32 %v5615_v44, %v1509_v29 }
 0x1bc   :  { %v1647_v46 = vmax.f32 %v1514_v43, %v1642_v41 }
 0x1bd   :  { %v1494_v47 = vpop.f32.mrb[112].mxu0  ;;  %v1627_v0 = vpop.f32.mrb[112].mxu1 }
 0x1be   :  { %v1510_v48 = vmax.f32 %v1473_v20, %v1494_v47  ;;  %v4359_v49 = vpop.f32.mrb[113].mxu0  ;;  %v1643_v36 = vmax.f32 %v1606_v21, %v1627_v0  ;;  %v4383_v54 = vpop.f32.mrb[113].mxu1 }
 0x1bf   :  { %v1497_v40 = vpop.f32.mrb[114].mxu0  ;;  %v1630_v56 = vpop.f32.mrb[114].mxu1 }
 0x1c0   :  { %v1515_v57 = vmax.f32 %v1382_v62, %v1510_v48  ;;  %v1511_v45 = vmax.f32 %v1478_v23, %v1497_v40  ;;  %v4360_v58 = vpop.f32.mrb[115].mxu0  ;;  %v1644_v59 = vmax.f32 %v1611_v2, %v1630_v56  ;;  %v4384_v3 = vpop.f32.mrb[115].mxu1 }
 0x1c2   :  { %v1516_v61 = vmax.f32 %v1383_v53, %v1511_v45  ;;  %v1648_v1 = vmax.f32 %v1515_v57, %v1643_v36 }
 0x1c4   :  { %v1649_v50 = vmax.f32 %v1516_v61, %v1644_v59 }
 0x1c5   :  { %v1502_v33 = vpop.f32.mrb[116].mxu0  ;;  %v1635_v63 = vpop.f32.mrb[116].mxu1 }
 0x1c6   :  { %v1512_v44 = vmax.f32 %v1481_v27, %v1502_v33  ;;  %v4363_v8 = vpop.f32.mrb[117].mxu0  ;;  %v1645_v52 = vmax.f32 %v1614_v28, %v1635_v63  ;;  %v4387_v55 = vpop.f32.mrb[117].mxu1 }
 0x1c7   :  { %v1505_v9 = vpop.f32.mrb[118].mxu0  ;;  %v1638_v7 = vpop.f32.mrb[118].mxu1 }
 0x1c8   :  { %v1517_v10 = vmax.f32 %v1384_v16, %v1512_v44  ;;  %v1513_v11 = vmax.f32 %v1486_v31, %v1505_v9  ;;  %v4364_v51 = vpop.f32.mrb[119].mxu0  ;;  %v1646_v60 = vmax.f32 %v1619_v6, %v1638_v7  ;;  %v4388_v62 = vpop.f32.mrb[119].mxu1 }
 0x1ca   :  { %v1518_v12 = vmax.f32 %v1385_v32, %v1513_v11  ;;  %v1650_v13 = vmax.f32 %v1517_v10, %v1645_v52 }
 0x1cc   :  { %v1651_v14 = vmax.f32 %v1518_v12, %v1646_v60 }
 0x1cd   :  { %v1736_v15 = vpop.f32.mrb[120].mxu0  ;;  %v1869_v53 = vpop.f32.mrb[120].mxu1 }
 0x1ce   :  { %v4395_v4 = vpop.f32.mrb[121].mxu0  ;;  %v4419_v17 = vpop.f32.mrb[121].mxu1 }
 0x1cf   :  { %v1739_v18 = vpop.f32.mrb[122].mxu0  ;;  %v1872_v19 = vpop.f32.mrb[122].mxu1 }
 0x1d0   :  { %v4396_v20 = vpop.f32.mrb[123].mxu0  ;;  %v4420_v21 = vpop.f32.mrb[123].mxu1 }
 0x1d5   :  { %v1744_v5 = vpop.f32.mrb[124].mxu0  ;;  %v1877_v22 = vpop.f32.mrb[124].mxu1 }
 0x1d6   :  { %v4399_v23 = vpop.f32.mrb[125].mxu0  ;;  %v4423_v2 = vpop.f32.mrb[125].mxu1 }
 0x1d7   :  { %v1747_v16 = vpop.f32.mrb[126].mxu0  ;;  %v1880_v24 = vpop.f32.mrb[126].mxu1  ;;  %v3802_v23 = vld [vmem:[%s6037_s3] ss:$0 sm:$0xff] }
 0x1d8   :  { %v4400_v25 = vpop.f32.mrb[127].mxu0  ;;  %v4424_v27 = vpop.f32.mrb[127].mxu1 }
 0x1dd   :  { %v1752_v28 = vpop.f32.mrb[128].mxu0  ;;  %v1885_v32 = vpop.f32.mrb[128].mxu1 }
 0x1de   :  { %v4403_v26 = vpop.f32.mrb[129].mxu0  ;;  %v4427_v30 = vpop.f32.mrb[129].mxu1 }
 0x1df   :  { %v1755_v31 = vpop.f32.mrb[130].mxu0  ;;  %v1888_v6 = vpop.f32.mrb[130].mxu1 }
 0x1e0   :  { %v1775_v34 = vmax.f32 %v1736_v15, %v1755_v31  ;;  %v4404_v35 = vpop.f32.mrb[131].mxu0  ;;  %v1908_v37 = vmax.f32 %v1869_v53, %v1888_v6  ;;  %v4428_v38 = vpop.f32.mrb[131].mxu1 }
 0x1e2   :  { %v1780_v29 = vmax.f32 %v1647_v46, %v1775_v34 }
 0x1e4   :  { %v1913_v39 = vmax.f32 %v1780_v29, %v1908_v37 }
 0x1e5   :  { %v1760_v41 = vpop.f32.mrb[132].mxu0  ;;  %v1893_v42 = vpop.f32.mrb[132].mxu1 }
 0x1e6   :  { %v1776_v43 = vmax.f32 %v1739_v18, %v1760_v41  ;;  %v4407_v47 = vpop.f32.mrb[133].mxu0  ;;  %v1909_v0 = vmax.f32 %v1872_v19, %v1893_v42  ;;  %v4431_v48 = vpop.f32.mrb[133].mxu1 }
 0x1e7   :  { %v1763_v49 = vpop.f32.mrb[134].mxu0  ;;  %v1896_v36 = vpop.f32.mrb[134].mxu1 }
 0x1e8   :  { %v1781_v54 = vmax.f32 %v1648_v1, %v1776_v43  ;;  %v1777_v40 = vmax.f32 %v1744_v5, %v1763_v49  ;;  %v4408_v56 = vpop.f32.mrb[135].mxu0  ;;  %v1910_v57 = vmax.f32 %v1877_v22, %v1896_v36  ;;  %v4432_v45 = vpop.f32.mrb[135].mxu1 }
 0x1e9   :  { %v4853_v56 = vld [vmem:[%s6036_s4] sm:$0xff]  }
 0x1ea   :  { %v1782_v58 = vmax.f32 %v1649_v50, %v1777_v40  ;;  %v1914_v59 = vmax.f32 %v1781_v54, %v1909_v0 }
 0x1ec   :  { %v1915_v3 = vmax.f32 %v1782_v58, %v1910_v57  ;;  %v4854_v57 = vld [vmem:[%s6036_s4 + $0x100] sm:$0xff]  }
 0x1ed   :  { %v1768_v61 = vpop.f32.mrb[136].mxu0  ;;  %v1901_v33 = vpop.f32.mrb[136].mxu1 }
 0x1ee   :  { %v1778_v46 = vmax.f32 %v1747_v16, %v1768_v61  ;;  %v4411_v63 = vpop.f32.mrb[137].mxu0  ;;  %v1911_v44 = vmax.f32 %v1880_v24, %v1901_v33  ;;  %v4435_v8 = vpop.f32.mrb[137].mxu1 }
 0x1ef   :  { %v1771_v52 = vpop.f32.mrb[138].mxu0  ;;  %v1904_v55 = vpop.f32.mrb[138].mxu1  ;;  %v4855_v63 = vld [vmem:[%s6036_s4 + $0x8] sm:$0xff]  }
 0x1f0   :  { %v1783_v9 = vmax.f32 %v1650_v13, %v1778_v46  ;;  %v1779_v7 = vmax.f32 %v1752_v28, %v1771_v52  ;;  %v4412_v10 = vpop.f32.mrb[139].mxu0  ;;  %v1912_v11 = vmax.f32 %v1885_v32, %v1904_v55  ;;  %v4436_v1 = vpop.f32.mrb[139].mxu1  ;;  %v5677_v52 = vld [vmem:[#allocation2 + $0x30] sm:$0xff] }
 0x1f2   :  { %v1784_v51 = vmax.f32 %v1651_v14, %v1779_v7  ;;  %v1916_v60 = vmax.f32 %v1783_v9, %v1911_v44  ;;  %v4856_v44 = vld [vmem:[%s6036_s4 + $0x108] sm:$0xff]   ;;  %v4857_v9 = vld [vmem:[%s6036_s4 + $0x10] sm:$0xff]  }
 0x1f3   :  { %v4858_v7 = vld [vmem:[%s6036_s4 + $0x110] sm:$0xff]  }
 0x1f4   :  { %v1917_v62 = vmax.f32 %v1784_v51, %v1912_v11 }
 0x1f5   :  { %v2002_v12 = vpop.f32.mrb[140].mxu0 }
 0x1f6   :  { %v4443_v50 = vpop.f32.mrb[141].mxu0 }
 0x1f7   :  { %v2005_v15 = vpop.f32.mrb[142].mxu0 }
 0x1f8   :  { %v4444_v53 = vpop.f32.mrb[143].mxu0 }
 0x1fd   :  { %v2010_v4 = vpop.f32.mrb[144].mxu0 }
 0x1fe   :  { %v4447_v17 = vpop.f32.mrb[145].mxu0 }
 0x1ff   :  { %v2013_v18 = vpop.f32.mrb[146].mxu0  ;;  %v4861_v17 = vld [vmem:[%s6036_s4 + $0x20] sm:$0xff]  }
 0x200   :  { %v4448_v19 = vpop.f32.mrb[147].mxu0 }
 0x205   :  { %v2018_v20 = vpop.f32.mrb[148].mxu0 }
 0x206   :  { %v4451_v21 = vpop.f32.mrb[149].mxu0 }
 0x207   :  { %v2021_v5 = vpop.f32.mrb[150].mxu0  ;;  %v4863_v21 = vld [vmem:[%s6036_s4 + $0x28] sm:$0xff]  }
 0x208   :  { %v2041_v22 = vmax.f32 %v2002_v12, %v2021_v5  ;;  %v4452_v13 = vpop.f32.mrb[151].mxu0  ;;  %v4860_v12 = vld [vmem:[%s6036_s4 + $0x118] sm:$0xff]   ;;  %v4864_v5 = vld [vmem:[%s6036_s4 + $0x128] sm:$0xff]  }
 0x209   :  { %v4866_v13 = vld [vmem:[%s6036_s4 + $0x130] sm:$0xff]  }
 0x20a   :  { %v2046_v14 = vmax.f32 %v1913_v39, %v2041_v22  ;;  %v4865_v22 = vld [vmem:[%s6036_s4 + $0x30] sm:$0xff]  }
 0x20c   :  { %v2058_v2 = vadd.f32 %v3802_v23, %v2046_v14  ;;  %v4868_v14 = vld [vmem:[%s6036_s4 + $0x138] sm:$0xff]  }
 0x20d   :  { %v2026_v16 = vpop.f32.mrb[152].mxu0 }
 0x20e   :  { %v2063_v24 = vmax.f32 %v2058_v2, 0.0  ;;  %v2042_v25 = vmax.f32 %v2005_v15, %v2026_v16  ;;  %v4455_v27 = vpop.f32.mrb[153].mxu0 }
 0x20f   :  { %v2029_v28 = vpop.f32.mrb[154].mxu0 }
 0x210   :  { %2071 = vst [vmem:[#allocation2 + $0x4] sm:$0xff] %v2063_v24  ;;  %v2047_v32 = vmax.f32 %v1914_v59, %v2042_v25  ;;  %v2043_v26 = vmax.f32 %v2010_v4, %v2029_v28  ;;  %v4456_v30 = vpop.f32.mrb[155].mxu0  ;;  %v4870_v25 = vld [vmem:[%s6036_s4 + $0x180] sm:$0xff]   ;;  %v4871_v28 = vld [vmem:[%s6036_s4 + $0xc8] sm:$0xff]  }
 0x212   :  { %v2059_v31 = vadd.f32 %v3802_v23, %v2047_v32  ;;  %v2048_v6 = vmax.f32 %v1915_v3, %v2043_v26  ;;  %v4872_v32 = vld [vmem:[%s6036_s4 + $0x188] sm:$0xff]  }
 0x214   :  { %v2064_v34 = vmax.f32 %v2059_v31, 0.0  ;;  %v2060_v35 = vadd.f32 %v3802_v23, %v2048_v6  ;;  %v4873_v6 = vld [vmem:[%s6036_s4 + $0xd0] sm:$0xff]  }
 0x215   :  { %v2034_v37 = vpop.f32.mrb[156].mxu0 }
 0x216   :  { %2072 = vst [vmem:[#allocation2 + $0xc] sm:$0xff] %v2064_v34  ;;  %v2065_v38 = vmax.f32 %v2060_v35, 0.0  ;;  %v2044_v29 = vmax.f32 %v2013_v18, %v2034_v37  ;;  %v4459_v41 = vpop.f32.mrb[157].mxu0  ;;  %v5651_v39 = vpack.c.bf16 %v2064_v34, %v2063_v24  ;;  %v4862_v18 = vld [vmem:[%s6036_s4 + $0x120] sm:$0xff]   ;;  %v4874_v34 = vld [vmem:[%s6036_s4 + $0x190] sm:$0xff]  }
 0x217   :  { %v2037_v42 = vpop.f32.mrb[158].mxu0  ;;  %v2102_v40 = vld [vmem:[#allocation2 + $0x1] sm:$0xff] }
 0x218   :  { %2073 = vst [vmem:[#allocation2 + $0x14] ss:$8 sps:$4 sm:$0xff] %v2065_v38   ;;  %v2049_v43 = vmax.f32 %v1916_v60, %v2044_v29  ;;  %v2045_v47 = vmax.f32 %v2018_v20, %v2037_v42  ;;  %v4460_v0 = vpop.f32.mrb[159].mxu0  ;;  %v2337_v58 = vld [vmem:[#allocation2 + $0x2] sm:$0xff]  ;;  %v4875_v38 = vld [vmem:[%s6036_s4 + $0xd8] sm:$0xff]  }
 0x219   :  { %v2077_v16 = vld [vmem:[#allocation2] sm:$0xff]  ;;  %v4876_v29 = vld [vmem:[%s6036_s4 + $0x198] sm:$0xff]  }
 0x21a   :  { %v2061_v48 = vadd.f32 %v3802_v23, %v2049_v43  ;;  %v2050_v49 = vmax.f32 %v1917_v62, %v2045_v47  ;;  %v4859_v62 = vld [vmem:[%s6036_s4 + $0x18] sm:$0xff]   ;;  %v4869_v24 = vld [vmem:[%s6036_s4 + $0xc0] sm:$0xff]  }
 0x21b   :  { %v4877_v43 = vld [vmem:[%s6036_s4 + $0xe0] sm:$0xff]  }
 0x21c   :  { %v5653_v36 = vmax.f32 %v2061_v48, 0.0  ;;  %v5655_v54 = vadd.f32 %v3802_v23, %v2050_v49  ;;  %v4867_v23 = vld [vmem:[%s6036_s4 + $0x38] sm:$0xff]   ;;  %v4878_v47 = vld [vmem:[%s6036_s4 + $0x1a0] sm:$0xff]   ;;  %v4879_v49 = vld [vmem:[%s6036_s4 + $0xe8] sm:$0xff]  }
 0x21d   :  { %v2103_v45 = vld [vmem:[#allocation2 + $0x9] sm:$0xff] }
 0x21e   :  { %v2338_v59 = vld [vmem:[#allocation2 + $0xa] sm:$0xff]  ;;  %2075 = vst [vmem:[#allocation2 + $0x20] sm:$0xff] %v5653_v36  ;;  %v2067_v3 = vmax.f32 %v5655_v54, 0.0  ;;  %v2108_v61 = vpack.c.bf16 %v2103_v45, %v2102_v40  ;;  %v4883_v45 = vld [vmem:[%s6036_s4 + $0xf8] sm:$0xff]  }
 0x21f   :  { %v2343_v33 = vpack.c.bf16 %v2338_v59, %v2337_v58  ;;  %v5667_v46 = vld [vmem:[#allocation2 + $0x18] sm:$0xff]  ;;  %v5741_v2 = vld [vmem:[#allocation2 + $0x8] sm:$0xff]  ;;  %v5765_v26 = vld [vmem:[#allocation2 + $0x10] sm:$0xff] }
 0x220   :  { %2076 = vst [vmem:[#allocation2 + $0x28] sm:$0xff] %v2067_v3  ;;  %4478 = vmatmul.mubr.bf16.vlgmr.msra.gmra.mrb[140].mxu1 %v2108_v61  ;;  %v3160_v8 = vpack.c.bf16 %v5653_v36, %v5667_v46  ;;  %v2104_v55 = vld [vmem:[#allocation2 + $0x11] sm:$0xff]  ;;  %v2083_v27 = vpack.c.bf16 %v5741_v2, %v2077_v16  ;;  %v2084_v35 = vpack.c.bf16 %v5667_v46, %v5765_v26  ;;  %v4880_v40 = vld [vmem:[%s6036_s4 + $0x1a8] sm:$0xff]  }
 0x221   :  { %4534 = vmatmul.mubr.bf16.vlgmr.msra.gmra.mrb[160].mxu0 %v2343_v33  ;;  %4490 = vmatpush3.bf16.msra.mxu1 %v4853_v56  ;;  %v2339_v11 = vld [vmem:[#allocation2 + $0x12] sm:$0xff]  ;;  %v4885_v33 = vld [vmem:[%s6036_s4 + $0x140] sm:$0xff]   ;;  %v4896_v16 = vld [vmem:[%s6036_s4 + $0x228] sm:$0xff]  }
 0x222   :  { %4574 = vmatpush3.bf16.msra.mxu0 %v4854_v57  ;;  %4491 = vmatprep.subr.bf16.mxu1 %v5677_v52  ;;  %v2611_v31 = vld [vmem:[#allocation2 + $0x14] sm:$0xff]  ;;  %v2474_v59 = vld [vmem:[#allocation2 + $0xb] sm:$0xff] }
 0x223   :  { %4575 = vmatprep.subr.bf16.mxu0 %v5677_v52  ;;  %4481 = vmatprep.mubr.msk.bf16.mxu1 %vm4913_vm1, %v5677_v52  ;;  %v4881_v56 = vld [vmem:[%s6036_s4 + $0xf0] sm:$0xff]   ;;  %v4884_v58 = vld [vmem:[%s6036_s4 + $0x1b8] sm:$0xff]  }
 0x224   :  { %4537 = vmatprep.mubr.msk.bf16.mxu0 %vm4913_vm1, %v5677_v52  ;;  %v4882_v57 = vld [vmem:[%s6036_s4 + $0x1b0] sm:$0xff]  }
 0x225   :  { %4492 = vmatpush3.bf16.msra.mxu1 %v4855_v63  ;;  %v2105_v10 = vld [vmem:[#allocation2 + $0x19] sm:$0xff]  ;;  %v2882_v61 = vld [vmem:[#allocation2 + $0xe] sm:$0xff]  ;;  %v2473_v63 = vld [vmem:[#allocation2 + $0x3] sm:$0xff] }
 0x226   :  { %4576 = vmatpush3.bf16.msra.mxu0 %v4856_v44  ;;  %v2340_v1 = vld [vmem:[#allocation2 + $0x1a] sm:$0xff]  ;;  %4493 = vmatprep.subr.bf16.mxu1 %v5677_v52  ;;  %v2109_v51 = vpack.c.bf16 %v2105_v10, %v2104_v55  ;;  %v2881_v44 = vld [vmem:[#allocation2 + $0x6] sm:$0xff]  ;;  %v4907_v54 = vld [vmem:[%s6036_s4 + $0x1f0] sm:$0xff]  }
 0x227   :  { %4577 = vmatprep.subr.bf16.mxu0 %v5677_v52  ;;  %v2344_v60 = vpack.c.bf16 %v2340_v1, %v2339_v11  ;;  %v2106_v50 = vld [vmem:[#allocation2 + $0x21] sm:$0xff]  ;;  %v2107_v15 = vld [vmem:[#allocation2 + $0x29] sm:$0xf] }
 0x228   :  { %4482 = vmatmul.mubr.bf16.gmra.mrb[144].mxu1 %v2109_v51  ;;  %v2341_v53 = vld [vmem:[#allocation2 + $0x22] sm:$0xff]  ;;  %v2342_v4 = vld [vmem:[#allocation2 + $0x2a] sm:$0xf]  ;;  %v2110_v19 = vpack.c.bf16 %v2107_v15, %v2106_v50  ;;  %v4890_v50 = vld [vmem:[%s6036_s4 + $0x210] sm:$0xff]  }
 0x229   :  { %4538 = vmatmul.mubr.bf16.gmra.mrb[164].mxu0 %v2344_v60  ;;  %4494 = vmatpush3.bf16.msra.mxu1 %v4857_v9  ;;  %v2345_v20 = vpack.c.bf16 %v2342_v4, %v2341_v53  ;;  %v2612_v30 = vld [vmem:[#allocation2 + $0x1c] sm:$0xff]  ;;  %v2082_v41 = vld [vmem:[#allocation2 + $0x28] sm:$0xf]  ;;  %v2614_v42 = vld [vmem:[#allocation2 + $0x2c] sm:$0xf]  ;;  %v2479_v9 = vpack.c.bf16 %v2474_v59, %v2473_v63 }
 0x22a   :  { %4578 = vmatpush3.bf16.msra.mxu0 %v4858_v7  ;;  %4495 = vmatprep.subr.bf16.mxu1 %v5677_v52  ;;  %v2616_v37 = vpack.c.bf16 %v2612_v30, %v2611_v31  ;;  %v2085_v0 = vpack.c.bf16 %v2082_v41, %v5653_v36  ;;  %v4886_v55 = vld [vmem:[%s6036_s4 + $0x200] sm:$0xff]   ;;  %v2887_v7 = vpack.c.bf16 %v2882_v61, %v2881_v44  ;;  %v4887_v10 = vld [vmem:[%s6036_s4 + $0x148] sm:$0xff]   ;;  %v4889_v60 = vld [vmem:[%s6036_s4 + $0x150] sm:$0xff]  }
 0x22b   :  { %4579 = vmatprep.subr.bf16.mxu0 %v5677_v52  ;;  %4485 = vmatprep.mubr.msk.bf16.mxu1 %vm4913_vm1, %v5677_v52  ;;  %v4888_v11 = vld [vmem:[%s6036_s4 + $0x208] sm:$0xff]   ;;  %v2476_v1 = vld [vmem:[#allocation2 + $0x1b] sm:$0xff] }
 0x22c   :  { %4541 = vmatprep.mubr.msk.bf16.mxu0 %vm4913_vm1, %v5677_v52  ;;  %v2884_v51 = vld [vmem:[#allocation2 + $0x1e] sm:$0xff] }
 0x22d   :  { %4496 = vmatpush3.bf16.msra.mxu1 %v4859_v62  ;;  %v2475_v62 = vld [vmem:[#allocation2 + $0x13] sm:$0xff]  ;;  %v2745_v30 = vld [vmem:[#allocation2 + $0x5] sm:$0xff] }
 0x22e   :  { %4580 = vmatpush3.bf16.msra.mxu0 %v4860_v12  ;;  %4497 = vmatprep.subr.bf16.mxu1 %v5677_v52  ;;  %v2883_v12 = vld [vmem:[#allocation2 + $0x16] sm:$0xff]  ;;  %v2480_v15 = vpack.c.bf16 %v2476_v1, %v2475_v62  ;;  %v4901_v31 = vld [vmem:[%s6036_s4 + $0x1c0] sm:$0xff]  }
 0x22f   :  { %4581 = vmatprep.subr.bf16.mxu0 %v5677_v52  ;;  %v2888_v53 = vpack.c.bf16 %v2884_v51, %v2883_v12  ;;  %v4891_v4 = vld [vmem:[%s6036_s4 + $0x158] sm:$0xff]   ;;  %v2749_v41 = vld [vmem:[#allocation2 + $0x25] sm:$0xff] }
 0x230   :  { %4486 = vmatmul.mubr.bf16.gmra.mrb[148].mxu1 %v2110_v19  ;;  %v2478_v19 = vld [vmem:[#allocation2 + $0x2b] sm:$0xf]  ;;  %v4905_v36 = vld [vmem:[%s6036_s4 + $0x1e0] sm:$0xff]  }
 0x231   :  { %4542 = vmatmul.mubr.bf16.gmra.mrb[168].mxu0 %v2345_v20  ;;  %4498 = vmatpush3.bf16.msra.mxu1 %v4861_v17  ;;  %v4892_v17 = vld [vmem:[%s6036_s4 + $0x218] sm:$0xff]   ;;  %v2885_v20 = vld [vmem:[#allocation2 + $0x26] sm:$0xff] }
 0x232   :  { %4582 = vmatpush3.bf16.msra.mxu0 %v4862_v18  ;;  %4499 = vmatprep.subr.bf16.mxu1 %v5677_v52  ;;  %v2477_v18 = vld [vmem:[#allocation2 + $0x23] sm:$0xff] }
 0x233   :  { %4583 = vmatprep.subr.bf16.mxu0 %v5677_v52  ;;  %4505 = vmatprep.mubr.msk.bf16.mxu1 %vm4913_vm1, %v5677_v52 }
 0x234   :  { %4589 = vmatprep.mubr.msk.bf16.mxu0 %vm4913_vm1, %v5677_v52 }
 0x235   :  { %4500 = vmatpush3.bf16.msra.mxu1 %v4863_v21  ;;  %v2886_v21 = vld [vmem:[#allocation2 + $0x2e] sm:$0xf] }
 0x236   :  { %4584 = vmatpush3.bf16.msra.mxu0 %v4864_v5  ;;  %4501 = vmatprep.subr.bf16.mxu1 %v5677_v52  ;;  %v4893_v5 = vld [vmem:[%s6036_s4 + $0x160] sm:$0xff]  }
 0x237   :  { %4585 = vmatprep.subr.bf16.mxu0 %v5677_v52 }
 0x239   :  { %4502 = vmatpush3.bf16.msra.mxu1 %v4865_v22  ;;  %v4894_v22 = vld [vmem:[%s6036_s4 + $0x220] sm:$0xff]  }
 0x23a   :  { %4586 = vmatpush3.bf16.msra.mxu0 %v4866_v13  ;;  %4503 = vmatprep.subr.bf16.mxu1 %v5677_v52  ;;  %v2481_v13 = vpack.c.bf16 %v2478_v19, %v2477_v18 }
 0x23b   :  { %4587 = vmatprep.subr.bf16.mxu0 %v5677_v52 }
 0x23d   :  { %4504 = vmatpush3.bf16.msra.mxu1 %v4867_v23  ;;  %v2889_v23 = vpack.c.bf16 %v2886_v21, %v2885_v20 }
 0x23e   :  { %4588 = vmatpush3.bf16.msra.mxu0 %v4868_v14  ;;  %4545 = vmatprep.subr.bf16.mxu1 %v5677_v52  ;;  %v4895_v14 = vld [vmem:[%s6036_s4 + $0x168] sm:$0xff]  }
 0x23f   :  { %4629 = vmatprep.subr.bf16.mxu0 %v5677_v52 }
 0x240   :  { %4506 = vmatmul.mubr.bf16.vlgmr.msra.gmra.mrb[152].mxu1 %v2083_v27  ;;  %v4899_v27 = vld [vmem:[%s6036_s4 + $0x178] sm:$0xff]  }
 0x241   :  { %4590 = vmatmul.mubr.bf16.vlgmr.msra.gmra.mrb[172].mxu0 %v5651_v39  ;;  %4546 = vmatpush3.bf16.msra.mxu1 %v4869_v24  ;;  %v2613_v39 = vld [vmem:[#allocation2 + $0x24] sm:$0xff]  ;;  %v4897_v24 = vld [vmem:[%s6036_s4 + $0x170] sm:$0xff]  }
 0x242   :  { %4630 = vmatpush3.bf16.msra.mxu0 %v4870_v25  ;;  %4547 = vmatprep.subr.bf16.mxu1 %v5677_v52  ;;  %v2617_v48 = vpack.c.bf16 %v2614_v42, %v2613_v39  ;;  %v4898_v25 = vld [vmem:[%s6036_s4 + $0x230] sm:$0xff]  }
 0x243   :  { %4631 = vmatprep.subr.bf16.mxu0 %v5677_v52  ;;  %4509 = vmatprep.mubr.msk.bf16.mxu1 %vm4913_vm1, %v5677_v52  ;;  %v2750_v39 = vld [vmem:[#allocation2 + $0x2d] sm:$0xf] }
 0x244   :  { %4593 = vmatprep.mubr.msk.bf16.mxu0 %vm4913_vm1, %v5677_v52  ;;  %v3158_v42 = vld [vmem:[#allocation2 + $0x30] sm:$0xf]  ;;  %v2753_v46 = vpack.c.bf16 %v2750_v39, %v2749_v41  ;;  %v3355_v39 = vld [vmem:[%s6038_s6 + $0x18] sm:$0xff] }
 0x245   :  { %4548 = vmatpush3.bf16.msra.mxu1 %v4871_v28  ;;  %v4900_v28 = vld [vmem:[%s6036_s4 + $0x238] sm:$0xff]   ;;  %v3354_v41 = vld [vmem:[%s6038_s6 + $0x10] sm:$0xff] }
 0x246   :  { %4632 = vmatpush3.bf16.msra.mxu0 %v4872_v32  ;;  %4549 = vmatprep.subr.bf16.mxu1 %v5677_v52  ;;  %v2746_v32 = vld [vmem:[#allocation2 + $0xd] sm:$0xff] }
 0x247   :  { %4633 = vmatprep.subr.bf16.mxu0 %v5677_v52 }
 0x248   :  { %4510 = vmatmul.mubr.bf16.gmra.mrb[156].mxu1 %v2084_v35  ;;  %v4902_v35 = vld [vmem:[%s6036_s4 + $0x1c8] sm:$0xff]  }
 0x249   :  { %4594 = vmatmul.mubr.bf16.gmra.mrb[176].mxu0 %v2616_v37  ;;  %4550 = vmatpush3.bf16.msra.mxu1 %v4873_v6  ;;  %v2751_v6 = vpack.c.bf16 %v2746_v32, %v2745_v30  ;;  %v2748_v37 = vld [vmem:[#allocation2 + $0x1d] sm:$0xff] }
 0x24a   :  { %4634 = vmatpush3.bf16.msra.mxu0 %v4874_v34  ;;  %4551 = vmatprep.subr.bf16.mxu1 %v5677_v52  ;;  %v3159_v34 = vpack.c.bf16 %v5765_v26, %v5741_v2  ;;  %v4903_v2 = vld [vmem:[%s6036_s4 + $0x1d0] sm:$0xff]   ;;  %v3352_v30 = vld [vmem:[%s6038_s6] sm:$0xff] }
 0x24b   :  { %4635 = vmatprep.subr.bf16.mxu0 %v5677_v52  ;;  %4513 = vmatprep.mubr.msk.bf16.mxu1 %vm4913_vm1, %v5677_v52 }
 0x24c   :  { %4597 = vmatprep.mubr.msk.bf16.mxu0 %vm4913_vm1, %v5677_v52 }
 0x24d   :  { %4552 = vmatpush3.bf16.msra.mxu1 %v4875_v38  ;;  %v2747_v38 = vld [vmem:[#allocation2 + $0x15] sm:$0xff] }
 0x24e   :  { %4636 = vmatpush3.bf16.msra.mxu0 %v4876_v29  ;;  %4553 = vmatprep.subr.bf16.mxu1 %v5677_v52  ;;  %v2752_v26 = vpack.c.bf16 %v2748_v37, %v2747_v38  ;;  %v4904_v29 = vld [vmem:[%s6036_s4 + $0x1d8] sm:$0xff]   ;;  %v3436_v37 = vld [vmem:[%s6038_s6 + $0x20] sm:$0xff]  ;;  %v3437_v38 = vld [vmem:[%s6038_s6 + $0x28] sm:$0xff] }
 0x24f   :  { %4637 = vmatprep.subr.bf16.mxu0 %v5677_v52 }
 0x250   :  { %4514 = vmatmul.mubr.bf16.gmra.mrb[160].mxu1 %v2085_v0  ;;  %v3017_v0 = vld [vmem:[#allocation2 + $0x7] sm:$0xff] }
 0x251   :  { %4598 = vmatmul.mubr.bf16.gmra.mrb[180].mxu0 %v2617_v48  ;;  %4554 = vmatpush3.bf16.msra.mxu1 %v4877_v43  ;;  %v4906_v43 = vld [vmem:[%s6036_s4 + $0x1e8] sm:$0xff]  }
 0x252   :  { %4638 = vmatpush3.bf16.msra.mxu0 %v4878_v47  ;;  %4555 = vmatprep.subr.bf16.mxu1 %v5677_v52  ;;  %v3018_v47 = vld [vmem:[#allocation2 + $0xf] sm:$0xff] }
 0x253   :  { %4639 = vmatprep.subr.bf16.mxu0 %v5677_v52  ;;  %4561 = vmatprep.mubr.msk.bf16.mxu1 %vm4913_vm1, %v5677_v52  ;;  %v3023_v48 = vpack.c.bf16 %v3018_v47, %v3017_v0 }
 0x254   :  { %4645 = vmatprep.mubr.msk.bf16.mxu0 %vm4913_vm1, %v5677_v52 }
 0x255   :  { %4556 = vmatpush3.bf16.msra.mxu1 %v4879_v49  ;;  %v3020_v49 = vld [vmem:[#allocation2 + $0x1f] sm:$0xff] }
 0x256   :  { %4640 = vmatpush3.bf16.msra.mxu0 %v4880_v40  ;;  %4557 = vmatprep.subr.bf16.mxu1 %v5677_v52  ;;  %v3019_v40 = vld [vmem:[#allocation2 + $0x17] sm:$0xff] }
 0x257   :  { %4641 = vmatprep.subr.bf16.mxu0 %v5677_v52 }
 0x259   :  { %4558 = vmatpush3.bf16.msra.mxu1 %v4881_v56  ;;  %v3024_v56 = vpack.c.bf16 %v3020_v49, %v3019_v40 }
 0x25a   :  { %4642 = vmatpush3.bf16.msra.mxu0 %v4882_v57  ;;  %4559 = vmatprep.subr.bf16.mxu1 %v5677_v52  ;;  %v3021_v57 = vld [vmem:[#allocation2 + $0x27] sm:$0xff] }
 0x25b   :  { %4643 = vmatprep.subr.bf16.mxu0 %v5677_v52 }
 0x25d   :  { %4560 = vmatpush3.bf16.msra.mxu1 %v4883_v45  ;;  %v3022_v45 = vld [vmem:[#allocation2 + $0x2f] sm:$0xf] }
 0x25e   :  { %4644 = vmatpush3.bf16.msra.mxu0 %v4884_v58  ;;  %4601 = vmatprep.subr.bf16.mxu1 %v5677_v52  ;;  %v3025_v58 = vpack.c.bf16 %v3022_v45, %v3021_v57 }
 0x25f   :  { %4685 = vmatprep.subr.bf16.mxu0 %v5677_v52 }
 0x260   :  { %4562 = vmatmul.mubr.bf16.vlgmr.msra.gmra.mrb[164].mxu1 %v2479_v9 }
 0x261   :  { %4646 = vmatmul.mubr.bf16.vlgmr.msra.gmra.mrb[184].mxu0 %v2887_v7  ;;  %4602 = vmatpush3.bf16.msra.mxu1 %v4885_v33 }
 0x262   :  { %4686 = vmatpush3.bf16.msra.mxu0 %v4886_v55  ;;  %4603 = vmatprep.subr.bf16.mxu1 %v5677_v52 }
 0x263   :  { %4687 = vmatprep.subr.bf16.mxu0 %v5677_v52  ;;  %4565 = vmatprep.mubr.msk.bf16.mxu1 %vm4913_vm1, %v5677_v52 }
 0x264   :  { %4649 = vmatprep.mubr.msk.bf16.mxu0 %vm4913_vm1, %v5677_v52 }
 0x265   :  { %4604 = vmatpush3.bf16.msra.mxu1 %v4887_v10 }
 0x266   :  { %4688 = vmatpush3.bf16.msra.mxu0 %v4888_v11  ;;  %4605 = vmatprep.subr.bf16.mxu1 %v5677_v52 }
 0x267   :  { %4689 = vmatprep.subr.bf16.mxu0 %v5677_v52 }
 0x268   :  { %4566 = vmatmul.mubr.bf16.gmra.mrb[168].mxu1 %v2480_v15 }
 0x269   :  { %4650 = vmatmul.mubr.bf16.gmra.mrb[188].mxu0 %v2888_v53  ;;  %4606 = vmatpush3.bf16.msra.mxu1 %v4889_v60 }
 0x26a   :  { %4690 = vmatpush3.bf16.msra.mxu0 %v4890_v50  ;;  %4607 = vmatprep.subr.bf16.mxu1 %v5677_v52 }
 0x26b   :  { %4691 = vmatprep.subr.bf16.mxu0 %v5677_v52  ;;  %4569 = vmatprep.mubr.msk.bf16.mxu1 %vm4913_vm1, %v5677_v52 }
 0x26c   :  { %4653 = vmatprep.mubr.msk.bf16.mxu0 %vm4913_vm1, %v5677_v52 }
 0x26d   :  { %4608 = vmatpush3.bf16.msra.mxu1 %v4891_v4 }
 0x26e   :  { %4692 = vmatpush3.bf16.msra.mxu0 %v4892_v17  ;;  %4609 = vmatprep.subr.bf16.mxu1 %v5677_v52 }
 0x26f   :  { %4693 = vmatprep.subr.bf16.mxu0 %v5677_v52 }
 0x270   :  { %4570 = vmatmul.mubr.bf16.gmra.mrb[172].mxu1 %v2481_v13 }
 0x271   :  { %4654 = vmatmul.mubr.bf16.gmra.mrb[192].mxu0 %v2889_v23  ;;  %4610 = vmatpush3.bf16.msra.mxu1 %v4893_v5 }
 0x272   :  { %4694 = vmatpush3.bf16.msra.mxu0 %v4894_v22  ;;  %4611 = vmatprep.subr.bf16.mxu1 %v5677_v52 }
 0x273   :  { %4695 = vmatprep.subr.bf16.mxu0 %v5677_v52  ;;  %4617 = vmatprep.mubr.msk.bf16.mxu1 %vm4913_vm1, %v5677_v52 }
 0x274   :  { %4701 = vmatprep.mubr.msk.bf16.mxu0 %vm4913_vm1, %v5677_v52 }
 0x275   :  { %4612 = vmatpush3.bf16.msra.mxu1 %v4895_v14 }
 0x276   :  { %4696 = vmatpush3.bf16.msra.mxu0 %v4896_v16  ;;  %4613 = vmatprep.subr.bf16.mxu1 %v5677_v52 }
 0x277   :  { %4697 = vmatprep.subr.bf16.mxu0 %v5677_v52 }
 0x279   :  { %4614 = vmatpush3.bf16.msra.mxu1 %v4897_v24 }
 0x27a   :  { %4698 = vmatpush3.bf16.msra.mxu0 %v4898_v25  ;;  %4615 = vmatprep.subr.bf16.mxu1 %v5677_v52 }
 0x27b   :  { %4699 = vmatprep.subr.bf16.mxu0 %v5677_v52 }
 0x27d   :  { %4616 = vmatpush3.bf16.msra.mxu1 %v4899_v27 }
 0x27e   :  { %4700 = vmatpush3.bf16.msra.mxu0 %v4900_v28  ;;  %4657 = vmatprep.subr.bf16.mxu1 %v5677_v52 }
 0x280   :  { %4618 = vmatmul.mubr.bf16.vlgmr.msra.gmra.mrb[176].mxu1 %v2751_v6 }
 0x281   :  { %4702 = vmatmul.mubr.bf16.vlgmr.msra.gmra.mrb[196].mxu0 %v3159_v34  ;;  %4658 = vmatpush3.bf16.msra.mxu1 %v4901_v31  ;;  %v3353_v31 = vld [vmem:[%s6038_s6 + $0x8] sm:$0xff] }
 0x282   :  { %4621 = vmatprep.mubr.msk.bf16.mxu1 %vm4913_vm1, %v5677_v52  ;;  %4659 = vmatprep.subr.bf16.mxu1 %v5677_v52  ;;  %v4741_v34 = vpack.c.bf16 %v3353_v31, %v3352_v30 }
 0x283   :  { %4705 = vmatprep.mubr.msk.bf16.mxu0 %vm4913_vm1, %v5677_v52 }
 0x285   :  { %4660 = vmatpush3.bf16.msra.mxu1 %v4902_v35  ;;  %v4914_v35 = vmov 0.0|0.0  }
 0x286   :  { %4661 = vmatprep.subr.bf16.mxu1 %v5677_v52  ;;  %4740 = vmatprep.subr.bf16.mxu0 %v4914_v35 }
 0x287   :  { %4742 = vmatpush3.bf16.msra.mxu0 %v4741_v34 }
 0x288   :  { %4622 = vmatmul.mubr.bf16.gmra.mrb[180].mxu1 %v2752_v26  ;;  %v4747_v26 = vpack.c.bf16 %v3437_v38, %v3436_v37  ;;  %4743 = vmatprep.subr.bf16.mxu0 %v4914_v35 }
 0x289   :  { %4706 = vmatmul.mubr.bf16.gmra.mrb[200].mxu0 %v3160_v8  ;;  %4662 = vmatpush3.bf16.msra.mxu1 %v4903_v2  ;;  %v3161_v8 = vpack.c.bf16 %v3158_v42, %v2067_v3  ;;  %v4908_v3 = vld [vmem:[%s6036_s4 + $0x1f8] sm:$0xff]   ;;  %v3438_v2 = vld [vmem:[%s6038_s6 + $0x30] sm:$0xff] }
 0x28a   :  { %4625 = vmatprep.mubr.msk.bf16.mxu1 %vm4913_vm1, %v5677_v52  ;;  %4663 = vmatprep.subr.bf16.mxu1 %v5677_v52 }
 0x28b   :  { %4709 = vmatprep.mubr.msk.bf16.mxu0 %vm4913_vm1, %v5677_v52 }
 0x28d   :  { %4664 = vmatpush3.bf16.msra.mxu1 %v4904_v29  ;;  %v3439_v29 = vld [vmem:[%s6038_s6 + $0x38] sm:$0xff] }
 0x28e   :  { %4665 = vmatprep.subr.bf16.mxu1 %v5677_v52 }
 0x290   :  { %4626 = vmatmul.mubr.bf16.gmra.mrb[184].mxu1 %v2753_v46  ;;  %v4744_v46 = vpack.c.bf16 %v3355_v39, %v3354_v41 }
 0x291   :  { %4710 = vmatmul.mubr.bf16.gmra.mrb[204].mxu0 %v3161_v8  ;;  %4666 = vmatpush3.bf16.msra.mxu1 %v4905_v36 }
 0x292   :  { %4673 = vmatprep.mubr.msk.bf16.mxu1 %vm4913_vm1, %v5677_v52  ;;  %4667 = vmatprep.subr.bf16.mxu1 %v5677_v52 }
 0x293   :  { %4721 = vmatprep.mubr.msk.f32.mxu0 %vm4913_vm1, %v5677_v52  ;;  %4745 = vmatpush3.bf16.msra.mxu0 %v4744_v46 }
 0x295   :  { %4668 = vmatpush3.bf16.msra.mxu1 %v4906_v43 }
 0x296   :  { %4669 = vmatprep.subr.bf16.mxu1 %v5677_v52 }
 0x299   :  { %4670 = vmatpush3.bf16.msra.mxu1 %v4907_v54 }
 0x29a   :  { %4671 = vmatprep.subr.bf16.mxu1 %v5677_v52 }
 0x29d   :  { %4672 = vmatpush3.bf16.msra.mxu1 %v4908_v3  ;;  %v4750_v3 = vpack.c.bf16 %v3439_v29, %v3438_v2 }
 0x29e   :  { %4746 = vmatprep.subr.bf16.mxu1 %v4914_v35 }
 0x2a0   :  { %4674 = vmatmul.mubr.bf16.vlgmr.msra.gmra.mrb[188].mxu1 %v3023_v48 }
 0x2a1   :  { %4677 = vmatprep.mubr.msk.bf16.mxu1 %vm4913_vm1, %v5677_v52  ;;  %4748 = vmatpush3.bf16.msra.mxu1 %v4747_v26 }
 0x2a2   :  { %4749 = vmatprep.subr.bf16.mxu1 %v4914_v35 }
 0x2a5   :  { %4751 = vmatpush3.bf16.msra.mxu1 %v4750_v3 }
 0x2a6   :  { %4735 = vmatprep.subr.mxu1 %v5677_v52 }
 0x2a8   :  { %4678 = vmatmul.mubr.bf16.gmra.mrb[192].mxu1 %v3024_v56 }
 0x2a9   :  { %4681 = vmatprep.mubr.msk.bf16.mxu1 %vm4913_vm1, %v5677_v52 }
 0x2b0   :  { %4682 = vmatmul.mubr.bf16.gmra.mrb[196].mxu1 %v3025_v58 }
 0x2b1   :  { %4732 = vmatprep.mubr.msk.f32.mxu1 %vm4913_vm1, %v5677_v52 }
 0x2f3   :  { %v2209_v59 = vpop.f32.mrb[140].mxu1 }
 0x2f4   :  { %v2444_v61 = vpop.f32.mrb[160].mxu0  ;;  %v4479_v33 = vpop.f32.mrb[141].mxu1 }
 0x2f5   :  { %v4535_v63 = vpop.f32.mrb[161].mxu0  ;;  %v2212_v44 = vpop.f32.mrb[142].mxu1 }
 0x2f6   :  { %v2447_v55 = vpop.f32.mrb[162].mxu0  ;;  %v4480_v9 = vpop.f32.mrb[143].mxu1 }
 0x2f7   :  { %v4536_v7 = vpop.f32.mrb[163].mxu0 }
 0x2fb   :  { %v2217_v10 = vpop.f32.mrb[144].mxu1 }
 0x2fc   :  { %v2452_v11 = vpop.f32.mrb[164].mxu0  ;;  %v4483_v1 = vpop.f32.mrb[145].mxu1 }
 0x2fd   :  { %v4539_v51 = vpop.f32.mrb[165].mxu0  ;;  %v2220_v60 = vpop.f32.mrb[146].mxu1 }
 0x2fe   :  { %v2455_v62 = vpop.f32.mrb[166].mxu0  ;;  %v4484_v12 = vpop.f32.mrb[147].mxu1 }
 0x2ff   :  { %v4540_v50 = vpop.f32.mrb[167].mxu0 }
 0x303   :  { %v2225_v15 = vpop.f32.mrb[148].mxu1 }
 0x304   :  { %v5959_v53 = vpop.f32.mrb[168].mxu0  ;;  %v4487_v4 = vpop.f32.mrb[149].mxu1 }
 0x305   :  { %v4543_v17 = vpop.f32.mrb[169].mxu0  ;;  %v2228_v18 = vpop.f32.mrb[150].mxu1 }
 0x306   :  { %v2463_v19 = vpop.f32.mrb[170].mxu0  ;;  %v4488_v20 = vpop.f32.mrb[151].mxu1 }
 0x307   :  { %v4544_v21 = vpop.f32.mrb[171].mxu0 }
 0x313   :  { %v2314_v5 = vpop.f32.mrb[152].mxu1 }
 0x314   :  { %v5961_v22 = vpop.f32.mrb[172].mxu0  ;;  %v2315_v13 = vadd.f32 %v2314_v5, %v2209_v59  ;;  %v4507_v23 = vpop.f32.mrb[153].mxu1 }
 0x315   :  { %v4591_v14 = vpop.f32.mrb[173].mxu0  ;;  %v2317_v16 = vpop.f32.mrb[154].mxu1 }
 0x316   :  { %v5963_v24 = vpop.f32.mrb[174].mxu0  ;;  %v2318_v25 = vadd.f32 %v2317_v16, %v2212_v44  ;;  %v4508_v27 = vpop.f32.mrb[155].mxu1  ;;  %v2467_v32 = vadd.f32 %v2444_v61, %v2315_v13 }
 0x317   :  { %v4592_v28 = vpop.f32.mrb[175].mxu0 }
 0x318   :  { %v2468_v6 = vadd.f32 %v2447_v55, %v2318_v25 }
 0x31b   :  { %v2322_v42 = vpop.f32.mrb[156].mxu1 }
 0x31c   :  { %v2724_v36 = vpop.f32.mrb[176].mxu0  ;;  %v2323_v8 = vadd.f32 %v2322_v42, %v2217_v10  ;;  %v4511_v43 = vpop.f32.mrb[157].mxu1 }
 0x31d   :  { %v4595_v54 = vpop.f32.mrb[177].mxu0  ;;  %v2325_v47 = vpop.f32.mrb[158].mxu1 }
 0x31e   :  { %v2727_v0 = vpop.f32.mrb[178].mxu0  ;;  %v2326_v48 = vadd.f32 %v2325_v47, %v2220_v60  ;;  %v4512_v49 = vpop.f32.mrb[159].mxu1  ;;  %v2469_v56 = vadd.f32 %v2452_v11, %v2323_v8 }
 0x31f   :  { %v4596_v40 = vpop.f32.mrb[179].mxu0 }
 0x320   :  { %v2470_v57 = vadd.f32 %v2455_v62, %v2326_v48 }
 0x323   :  { %v2330_v45 = vpop.f32.mrb[160].mxu1 }
 0x324   :  { %v2732_v58 = vpop.f32.mrb[180].mxu0  ;;  %v2331_v59 = vadd.f32 %v2330_v45, %v2225_v15  ;;  %v4515_v61 = vpop.f32.mrb[161].mxu1 }
 0x325   :  { %v4599_v33 = vpop.f32.mrb[181].mxu0  ;;  %v2333_v63 = vpop.f32.mrb[162].mxu1 }
 0x326   :  { %v2735_v44 = vpop.f32.mrb[182].mxu0  ;;  %v2334_v55 = vadd.f32 %v2333_v63, %v2228_v18  ;;  %v4516_v9 = vpop.f32.mrb[163].mxu1  ;;  %v2471_v10 = vadd.f32 %v5959_v53, %v2331_v59 }
 0x327   :  { %v4600_v7 = vpop.f32.mrb[183].mxu0 }
 0x328   :  { %v2472_v1 = vadd.f32 %v2463_v19, %v2334_v55 }
 0x333   :  { %v2580_v51 = vpop.f32.mrb[164].mxu1 }
 0x334   :  { %v2988_v11 = vpop.f32.mrb[184].mxu0  ;;  %v2603_v60 = vadd.f32 %v2580_v51, %v2467_v32  ;;  %v4563_v62 = vpop.f32.mrb[165].mxu1 }
 0x335   :  { %v4647_v12 = vpop.f32.mrb[185].mxu0  ;;  %v2583_v50 = vpop.f32.mrb[166].mxu1 }
 0x336   :  { %v2991_v52 = vpop.f32.mrb[186].mxu0  ;;  %v2604_v4 = vadd.f32 %v2583_v50, %v2468_v6  ;;  %v4564_v17 = vpop.f32.mrb[167].mxu1  ;;  %v2739_v20 = vadd.f32 %v5961_v22, %v2603_v60 }
 0x337   :  { %v4648_v15 = vpop.f32.mrb[187].mxu0 }
 0x338   :  { %v2740_v21 = vadd.f32 %v5963_v24, %v2604_v4 }
 0x33b   :  { %v2588_v18 = vpop.f32.mrb[168].mxu1 }
 0x33c   :  { %v2996_v5 = vpop.f32.mrb[188].mxu0  ;;  %v2605_v13 = vadd.f32 %v2588_v18, %v2469_v56  ;;  %v4567_v23 = vpop.f32.mrb[169].mxu1 }
 0x33d   :  { %v4651_v53 = vpop.f32.mrb[189].mxu0  ;;  %v2591_v19 = vpop.f32.mrb[170].mxu1 }
 0x33e   :  { %v2999_v14 = vpop.f32.mrb[190].mxu0  ;;  %v2606_v16 = vadd.f32 %v2591_v19, %v2470_v57  ;;  %v4568_v25 = vpop.f32.mrb[171].mxu1  ;;  %v2741_v28 = vadd.f32 %v2724_v36, %v2605_v13 }
 0x33f   :  { %v4652_v27 = vpop.f32.mrb[191].mxu0 }
 0x340   :  { %v2742_v32 = vadd.f32 %v2727_v0, %v2606_v16 }
 0x343   :  { %v2596_v30 = vpop.f32.mrb[172].mxu1 }
 0x344   :  { %v3004_v31 = vpop.f32.mrb[192].mxu0  ;;  %v2607_v6 = vadd.f32 %v2596_v30, %v2471_v10  ;;  %v4571_v34 = vpop.f32.mrb[173].mxu1 }
 0x345   :  { %v4655_v35 = vpop.f32.mrb[193].mxu0  ;;  %v2599_v22 = vpop.f32.mrb[174].mxu1 }
 0x346   :  { %v3007_v37 = vpop.f32.mrb[194].mxu0  ;;  %v2608_v24 = vadd.f32 %v2599_v22, %v2472_v1  ;;  %v4572_v38 = vpop.f32.mrb[175].mxu1  ;;  %v2743_v26 = vadd.f32 %v2732_v58, %v2607_v6 }
 0x347   :  { %v4656_v2 = vpop.f32.mrb[195].mxu0 }
 0x348   :  { %v2744_v29 = vadd.f32 %v2735_v44, %v2608_v24 }
 0x353   :  { %v2852_v41 = vpop.f32.mrb[176].mxu1 }
 0x354   :  { %v3260_v39 = vpop.f32.mrb[196].mxu0  ;;  %v2875_v42 = vadd.f32 %v2852_v41, %v2739_v20  ;;  %v4619_v46 = vpop.f32.mrb[177].mxu1 }
 0x355   :  { %v4703_v8 = vpop.f32.mrb[197].mxu0  ;;  %v2855_v43 = vpop.f32.mrb[178].mxu1 }
 0x356   :  { %v3263_v36 = vpop.f32.mrb[198].mxu0  ;;  %v2876_v54 = vadd.f32 %v2855_v43, %v2740_v21  ;;  %v4620_v3 = vpop.f32.mrb[179].mxu1  ;;  %v3011_v0 = vadd.f32 %v2988_v11, %v2875_v42  ;;  %v3875_v21 = vld [vmem:[%s6039_s5] ss:$0 sm:$0xff] }
 0x357   :  { %v4704_v47 = vpop.f32.mrb[199].mxu0 }
 0x358   :  { %v3012_v48 = vadd.f32 %v2991_v52, %v2876_v54 }
 0x35b   :  { %v2860_v49 = vpop.f32.mrb[180].mxu1 }
 0x35c   :  { %v3268_v40 = vpop.f32.mrb[200].mxu0  ;;  %v2877_v56 = vadd.f32 %v2860_v49, %v2741_v28  ;;  %v4623_v57 = vpop.f32.mrb[181].mxu1 }
 0x35d   :  { %v4707_v45 = vpop.f32.mrb[201].mxu0  ;;  %v2863_v59 = vpop.f32.mrb[182].mxu1 }
 0x35e   :  { %v3271_v58 = vpop.f32.mrb[202].mxu0  ;;  %v2878_v61 = vadd.f32 %v2863_v59, %v2742_v32  ;;  %v4624_v33 = vpop.f32.mrb[183].mxu1  ;;  %v3013_v44 = vadd.f32 %v2996_v5, %v2877_v56 }
 0x35f   :  { %v4708_v63 = vpop.f32.mrb[203].mxu0 }
 0x360   :  { %v3014_v55 = vadd.f32 %v2999_v14, %v2878_v61 }
 0x363   :  { %v2868_v9 = vpop.f32.mrb[184].mxu1 }
 0x364   :  { %v3276_v7 = vpop.f32.mrb[204].mxu0  ;;  %v2879_v10 = vadd.f32 %v2868_v9, %v2743_v26  ;;  %v4627_v1 = vpop.f32.mrb[185].mxu1 }
 0x365   :  { %v4711_v51 = vpop.f32.mrb[205].mxu0  ;;  %v2871_v60 = vpop.f32.mrb[186].mxu1 }
 0x366   :  { %v3279_v11 = vpop.f32.mrb[206].mxu0  ;;  %v2880_v62 = vadd.f32 %v2871_v60, %v2744_v29  ;;  %v4628_v12 = vpop.f32.mrb[187].mxu1  ;;  %v3015_v52 = vadd.f32 %v3004_v31, %v2879_v10 }
 0x367   :  { %v4712_v50 = vpop.f32.mrb[207].mxu0 }
 0x368   :  { %v3016_v4 = vadd.f32 %v3007_v37, %v2880_v62 }
 0x373   :  { %v3124_v17 = vpop.f32.mrb[188].mxu1 }
 0x374   :  { %v3147_v15 = vadd.f32 %v3124_v17, %v3011_v0  ;;  %v4675_v20 = vpop.f32.mrb[189].mxu1 }
 0x375   :  { %v3127_v18 = vpop.f32.mrb[190].mxu1 }
 0x376   :  { %v3283_v5 = vadd.f32 %v3260_v39, %v3147_v15  ;;  %v3148_v13 = vadd.f32 %v3127_v18, %v3012_v48  ;;  %v4676_v23 = vpop.f32.mrb[191].mxu1 }
 0x378   :  { %v3296_v53 = vadd.f32 %v3875_v21, %v3283_v5  ;;  %v3284_v19 = vadd.f32 %v3263_v36, %v3148_v13 }
 0x37a   :  { %v3302_v14 = vmax.f32 %v3296_v53, 0.0  ;;  %v3297_v16 = vadd.f32 %v3875_v21, %v3284_v19 }
 0x37b   :  { %v3132_v25 = vpop.f32.mrb[192].mxu1 }
 0x37c   :  { %v3303_v27 = vmax.f32 %v3297_v16, 0.0  ;;  %v3149_v28 = vadd.f32 %v3132_v25, %v3013_v44  ;;  %v4679_v32 = vpop.f32.mrb[193].mxu1  ;;  %v3309_v31 = vsel %vm3308_vm3, %v3302_v14, -inf  ;;  %v3515_v14 = vld [vmem:[%s6038_s6 + $0x40] sm:$0xff]  ;;  %v4911_v25 = vld [vmem:[#allocation2 + $0x30] sm:$0xff] }
 0x37d   :  { %v3135_v30 = vpop.f32.mrb[194].mxu1 }
 0x37e   :  { %v3311_v6 = vsel %vm3310_vm4, %v3303_v27, -inf  ;;  %v3285_v34 = vadd.f32 %v3268_v40, %v3149_v28  ;;  %v3150_v35 = vadd.f32 %v3135_v30, %v3014_v55  ;;  %v4680_v22 = vpop.f32.mrb[195].mxu1  ;;  %v3331_v29 = vsel %vm3330_vm5, %v3303_v27, -inf  ;;  %v3514_v27 = vld [vmem:[%s6040_s1] sm:$0x3] }
 0x37f   :  { %v3312_v37 = vmax.f32 %v3309_v31, %v3311_v6  ;;  %v3877_v30 = vld [vmem:[%s6041_s7] ss:$0 sm:$0xff]  ;;  %v3882_v22 = vld [vmem:[%s6042_s8 + $0x1] ss:$0 sm:$0xff] }
 0x380   :  { %v3298_v24 = vadd.f32 %v3875_v21, %v3285_v34  ;;  %v3286_v38 = vadd.f32 %v3271_v58, %v3150_v35 }
 0x381   :  { %v3313_v8 = vrot.slane %v3312_v37, 4 }
 0x382   :  { %v3304_v2 = vmax.f32 %v3298_v24, 0.0  ;;  %v3299_v39 = vadd.f32 %v3875_v21, %v3286_v38  ;;  %v3880_v24 = vld [vmem:[%s6042_s8] ss:$0 sm:$0xff]  ;;  %s4915_s8 = smov 127  }
 0x383   :  { %v3140_v26 = vpop.f32.mrb[196].mxu1  ;;  %v3314_v56 = vmax.f32 %v3312_v37, %v3313_v8  ;;  %v3883_v8 = vld [vmem:[%s6045_s10] ss:$0 sm:$0xff] }
 0x384   :  { %v3333_v41 = vsel %vm3332_vm6, %v3304_v2, -inf  ;;  %v3151_v42 = vadd.f32 %v3140_v26, %v3015_v52  ;;  %v4683_v46 = vpop.f32.mrb[197].mxu1  ;;  %v3305_v48 = vmax.f32 %v3299_v39, 0.0  ;;  %v3881_v39 = vld [vmem:[%s6044_s9] ss:$0 sm:$0xff] }
 0x385   :  { %v3334_v43 = vmax.f32 %v3331_v29, %v3333_v41  ;;  %v3143_v36 = vpop.f32.mrb[198].mxu1  ;;  %v3315_v63 = vrot.slane %v3314_v56, 2  ;;  %v17_v41 = vstv %s6043_s11 }
 0x386   :  { %v3287_v54 = vadd.f32 %v3276_v7, %v3151_v42  ;;  %v3152_v3 = vadd.f32 %v3143_v36, %v3016_v4  ;;  %v4684_v47 = vpop.f32.mrb[199].mxu1  ;;  %v3319_v58 = vsel %vm3308_vm3, %v3305_v48, -inf  ;;  %18 = vst [vmem:[#allocation3] sm:$0x1] %v17_v41 }
 0x387   :  { %v3335_v0 = vrot.slane %v3334_v43, 4  ;;  %v3316_v51 = vmax.f32 %v3314_v56, %v3315_v63 }
 0x388   :  { %v3300_v49 = vadd.f32 %v3875_v21, %v3287_v54  ;;  %v3288_v40 = vadd.f32 %v3279_v11, %v3152_v3 }
 0x389   :  { %v3336_v59 = vmax.f32 %v3334_v43, %v3335_v0  ;;  %v3317_v52 = vrot.slane %v3316_v51, 1 }
 0x38a   :  { %v3306_v57 = vmax.f32 %v3300_v49, 0.0  ;;  %v3301_v45 = vadd.f32 %v3875_v21, %v3288_v40 }
 0x38b   :  { %v3337_v7 = vrot.slane %v3336_v59, 2  ;;  %v3318_v5 = vmax.f32 %v3316_v51, %v3317_v52 }
 0x38c   :  { %v3320_v61 = vsel %vm3310_vm4, %v3306_v57, -inf  ;;  %v3307_v33 = vmax.f32 %v3301_v45, 0.0  ;;  %v3341_v55 = vsel %vm3330_vm5, %v3306_v57, -inf }
 0x38d   :  { %v3321_v44 = vmax.f32 %v3319_v58, %v3320_v61  ;;  %v3338_v62 = vmax.f32 %v3336_v59, %v3337_v7  ;;  %v3884_v48 = vld [vmem:[#allocation3] ss:$0 sm:$0xff] }
 0x38e   :  { %v3342_v9 = vsel %vm3332_vm6, %v3307_v33, -inf }
 0x38f   :  { %v3322_v10 = vrot.slane %v3321_v44, 4  ;;  %v3343_v1 = vmax.f32 %v3341_v55, %v3342_v9  ;;  %v3339_v15 = vrot.slane %v3338_v62, 1 }
 0x391   :  { %v3323_v60 = vmax.f32 %v3321_v44, %v3322_v10  ;;  %v3344_v11 = vrot.slane %v3343_v1, 4  ;;  %v3340_v53 = vmax.f32 %v3338_v62, %v3339_v15 }
 0x393   :  { %v3324_v12 = vrot.slane %v3323_v60, 2  ;;  %v3345_v50 = vmax.f32 %v3343_v1, %v3344_v11 }
 0x395   :  { %v3325_v4 = vmax.f32 %v3323_v60, %v3324_v12  ;;  %v3346_v17 = vrot.slane %v3345_v50, 2 }
 0x397   :  { %v3326_v20 = vrot.slane %v3325_v4, 1  ;;  %v3347_v21 = vmax.f32 %v3345_v50, %v3346_v17 }
 0x399   :  { %v3348_v18 = vrot.slane %v3347_v21, 1  ;;  %v3327_v13 = vmax.f32 %v3325_v4, %v3326_v20 }
 0x39b   :  { %v3329_v23 = vsel %vm3328_vm7, %v3318_v5, %v3327_v13  ;;  %v3349_v19 = vmax.f32 %v3347_v21, %v3348_v18 }
 0x39c   :  { %4722 = vmatmul.mubr.msk.f32.vlgmr.msra.gmra.mrb[208].mxu0 %vm3308_vm3, %v3329_v23 }
 0x39d   :  { %v3350_v16 = vsel %vm3328_vm7, %v3340_v53, %v3349_v19 }
 0x39e   :  { %4733 = vmatmul.mubr.msk.f32.vlgmr.msra.gmra.mrb[200].mxu1 %vm3308_vm3, %v3350_v16 }
 0x39f   :  { %4736 = vmatpush3.msra.mxu1 %v3515_v14  ;;  %4737 = vmatprep.mubr.msk.f32.mxu1 %vm4913_vm1, %v4911_v25 }
 0x3a6   :  { %4738 = vmatmul.mubr.msk.f32.vlgmr.msra.gmra.mrb[200].mxu1 %vm3516_vm8, %v3514_v27 }
 0x46f   :  { %v3425_v28 = vpop.f32.mrb[208].mxu0 }
 0x470   :  { %v4723_v32 = vpop.f32.mrb[209].mxu0  ;;  %v3435_v31 = vadd.f32 %v3877_v30, %v3425_v28 }
 0x479   :  { %v3586_v6 = vpop.f32.mrb[200].mxu1 }
 0x47a   :  { %v4753_v34 = vadd.f32 %v3586_v6, %v3435_v31  ;;  %v4739_v35 = vpop.f32.mrb[201].mxu1 }
 0x47c   :  { %v3591_v37 = vmax.f32 %v4753_v34, 0.0 }
 0x47e   :  { %v3616_v38 = vmul.f32 %v3882_v22, %v3591_v37  ;;  %v3597_v26 = vmul.f32 %v3880_v24, %v3591_v37 }
 0x480   :  { %v3617_v2 = vsel %vm3598_vm9, %v3616_v38, 0.0  ;;  %v3599_v29 = vsel %vm3598_vm9, %v3597_v26, 0.0 }
 0x481   :  { %3618 = vadd.xlane.f32.xlu0 %v3617_v2 }
 0x485   :  { %3600 = vadd.xlane.f32.xlu0 %v3599_v29 }
 0x50e   :  { %v3619_v42 = vpop.xlane.xlu0 %3618 }
 0x50f   :  { %v3620_v46 = vadd.f32 %v3881_v39, %v3619_v42 }
 0x511   :  { %v3621_v43 = vmax.f32 %v3620_v46, 0.0 }
 0x512   :  { %v3601_v36 = vpop.xlane.xlu0 %3600 }
 0x513   :  { %v3609_v54 = vadd.f32 %v3881_v39, %v3601_v36  ;;  %v3630_v3 = vmul.f32 %v3883_v8, %v3621_v43 }
 0x515   :  { %v3610_v47 = vmax.f32 %v3609_v54, 0.0  ;;  %3632 = vrot.lane.b32.xlu1 %v3630_v3, %s4915_s8 }
 0x517   :  { %v3629_v0 = vmul.f32 %v3883_v8, %v3610_v47 }
 0x587   :  { %v3633_v49 = vpop.permute.xlu1 %3632 }
 0x588   :  { %v3635_v40 = vadd.f32 %v3633_v49, %v3629_v0 }
 0x58a   :  { %v3643_v56 = vadd.f32 %v3884_v48, %v3635_v40 }
 0x58c   :  { %3645 = vst.msk [vmem:[%s6046_s12] sm:$0x3] %vm3644_vm10, %v3643_v56 }

</bundles_post_ra>
